<compile_context>
chip_gen: v5e
topology: v5e:2x2
jax: 0.10.0
libtpu: 0.0.40
codegen_flags: <defaults>
</compile_context>

<pallas_src>
import jax
import jax.numpy as jnp
from jax.experimental import pallas as pl
from jax.experimental.pallas import tpu as pltpu


_TP_MAX = 1024                      # spatial tile on the lane axis (multiple of 128)
_VMEM_LIMIT = 32 * 1024 * 1024      # safe on v5e/v6e (128 MiB phys) and v7x (64 MiB phys)


# ----------------------------------------------------------------------------
# Pallas kernels
# ----------------------------------------------------------------------------
def _silu_f32(z):
    # SiLU with exp + approx reciprocal on the EUP slot (keep f32: v5e EUP/VPU).
    return z * pl.reciprocal(1.0 + jnp.exp(-z), approx=True)


def _conv_bn_silu_kernel(p_ref, w_ref, shift_ref, o_ref):
    # p_ref: (N, K, TP) bf16   w_ref: (Cout, K) bf16 (BN scale pre-folded)
    # shift_ref: (Cout, 1) f32   o_ref: (N, Cout, TP)
    w = w_ref[...]
    shift = shift_ref[...]
    for n in range(p_ref.shape[0]):                       # small static batch
        y = jnp.dot(w, p_ref[n], preferred_element_type=jnp.float32)   # MXU
        y = y + shift                                      # f32 VPU epilogue
        o_ref[n] = _silu_f32(y).astype(o_ref.dtype)


def _conv_bn_silu_multi_kernel(p_ref, w_ref, scale_ref, shift_ref,
                               conv_ref, bn_ref, act_ref):
    # Same fused pipeline, but materializes all three intermediate features
    # (conv output, bn output, act output) that Encoder.forward collects for
    # the stem / head stages — one HBM read of the activations instead of three.
    w = w_ref[...]
    scale = scale_ref[...]
    shift = shift_ref[...]
    for n in range(p_ref.shape[0]):
        y = jnp.dot(w, p_ref[n], preferred_element_type=jnp.float32)
        conv_ref[n] = y.astype(conv_ref.dtype)
        z = y * scale + shift
        bn_ref[n] = z.astype(bn_ref.dtype)
        act_ref[n] = _silu_f32(z).astype(act_ref.dtype)


# ----------------------------------------------------------------------------
# JAX glue: NCHW im2col (bf16), alignment padding, pallas_call wrappers
# ----------------------------------------------------------------------------
def _im2col_nchw(x, kh, kw, stride, pad):
    """NCHW -> (N, Cin*kh*kw, Ho*Wo) patches.  K-ordering = (cin, kh, kw)."""
    if pad > 0:
        x = jnp.pad(x, ((0, 0), (0, 0), (pad, pad), (pad, pad)))
    N, C, Hp, Wp = x.shape
    Ho = (Hp - kh) // stride + 1
    Wo = (Wp - kw) // stride + 1
    cols = []
    for i in range(kh):
        for j in range(kw):
            cols.append(x[:, :, i:i + stride * Ho:stride, j:j + stride * Wo:stride])
    patches = jnp.stack(cols, axis=2)                     # (N, C, kh*kw, Ho, Wo)
    patches = patches.reshape(N, C * kh * kw, Ho * Wo)    # (N, K, P)
    return patches, Ho, Wo


def _prepare_conv(x, w_oihw, stride, pad):
    """Build bf16 patches padded to (K->16-multiple, P->128-multiple/TP)."""
    N, Cin, H, W = x.shape
    Cout, _, KH, KW = w_oihw.shape
    xb = x.astype(jnp.bfloat16)                           # halve im2col HBM bytes
    if KH == 1 and KW == 1 and pad == 0 and stride == 1:
        patches, Ho, Wo = xb.reshape(N, Cin, H * W), H, W  # 1x1: no im2col copy
    else:
        patches, Ho, Wo = _im2col_nchw(xb, KH, KW, stride, pad)
    K = patches.shape[1]
    K_pad = pl.cdiv(K, 16) * 16                           # bf16 sublane packing
    P = Ho * Wo
    P_pad = pl.cdiv(P, 128) * 128                         # lane-dense stores
    TP = min(P_pad, _TP_MAX)
    P_pad = pl.cdiv(P_pad, TP) * TP                       # tiles divide evenly
    if K_pad != K or P_pad != P:
        patches = jnp.pad(patches, ((0, 0), (0, K_pad - K), (0, P_pad - P)))
    return patches, K, K_pad, P, P_pad, TP, Ho, Wo, Cout, N


def _make_wmat(w_oihw, K, K_pad, scale=None):
    """(Cout,Cin,KH,KW) -> bf16 (Cout,K_pad); optionally fold BN scale."""
    Cout = w_oihw.shape[0]
    if scale is not None:
        w_oihw = w_oihw * scale.reshape(Cout, 1, 1, 1)
    wmat = w_oihw.reshape(Cout, K)
    if K_pad != K:
        wmat = jnp.pad(wmat, ((0, 0), (0, K_pad - K)))
    return wmat.astype(jnp.bfloat16)


def _compiler_params():
    return pltpu.CompilerParams(dimension_semantics=("parallel",),
                                vmem_limit_bytes=_VMEM_LIMIT)


def conv_bn_silu_block(x, w_oihw, scale, shift, *, stride, pad):
    """One backbone block = Conv + BN + SiLU, fused; single (act) output."""
    patches, K, K_pad, P, P_pad, TP, Ho, Wo, Cout, N = _prepare_conv(
        x, w_oihw, stride, pad)
    wmat = _make_wmat(w_oihw, K, K_pad, scale=scale)      # BN scale folded
    out = pl.pallas_call(
        _conv_bn_silu_kernel,
        out_shape=jax.ShapeDtypeStruct((N, Cout, P_pad), x.dtype),
        grid=(P_pad // TP,),
        in_specs=[
            pl.BlockSpec((N, K_pad, TP), lambda p: (0, 0, p)),   # patch tile
            pl.BlockSpec((Cout, K_pad), lambda p: (0, 0)),       # weight (resident)
            pl.BlockSpec((Cout, 1), lambda p: (0, 0)),           # BN shift
        ],
        out_specs=pl.BlockSpec((N, Cout, TP), lambda p: (0, 0, p)),
        compiler_params=_compiler_params(),
    )(patches, wmat, shift.reshape(Cout, 1))
    return out[:, :, :P].reshape(N, Cout, Ho, Wo)


def conv_bn_silu_stage(x, w_oihw, scale, shift, *, stride, pad):
    """Fused Conv+BN+SiLU that also emits the conv and bn intermediate features."""
    patches, K, K_pad, P, P_pad, TP, Ho, Wo, Cout, N = _prepare_conv(
        x, w_oihw, stride, pad)
    wmat = _make_wmat(w_oihw, K, K_pad)                   # raw conv weight
    out_spec = pl.BlockSpec((N, Cout, TP), lambda p: (0, 0, p))
    shp = jax.ShapeDtypeStruct((N, Cout, P_pad), x.dtype)
    conv, bn, act = pl.pallas_call(
        _conv_bn_silu_multi_kernel,
        out_shape=(shp, shp, shp),
        grid=(P_pad // TP,),
        in_specs=[
            pl.BlockSpec((N, K_pad, TP), lambda p: (0, 0, p)),
            pl.BlockSpec((Cout, K_pad), lambda p: (0, 0)),
            pl.BlockSpec((Cout, 1), lambda p: (0, 0)),
            pl.BlockSpec((Cout, 1), lambda p: (0, 0)),
        ],
        out_specs=(out_spec, out_spec, out_spec),
        compiler_params=_compiler_params(),
    )(patches, wmat, scale.reshape(Cout, 1), shift.reshape(Cout, 1))

    def to_img(t):
        return t[:, :, :P].reshape(N, Cout, Ho, Wo)

    return to_img(conv), to_img(bn), to_img(act)


# ----------------------------------------------------------------------------
# Deterministic synthetic parameters (no checkpoint loading)
# ----------------------------------------------------------------------------
_BLOCK_CFG = ((16, 24, 1), (24, 32, 2), (32, 48, 1))   # (cin, cout, stride)


def _conv_weight(key, cout, cin, kh, kw):
    fan_in = cin * kh * kw
    return jax.random.normal(key, (cout, cin, kh, kw), jnp.float32) / jnp.sqrt(fan_in)


def _bn_params(c, eps=1e-5):
    gamma = 1.0 + 0.01 * jnp.arange(c, dtype=jnp.float32)
    beta = 0.01 * jnp.arange(c, dtype=jnp.float32)
    mean = jnp.zeros((c,), jnp.float32)
    var = jnp.ones((c,), jnp.float32)
    scale = gamma / jnp.sqrt(var + eps)       # eval-mode BN folded to affine
    shift = beta - mean * scale
    return scale, shift


def init_params(key):
    ks = jax.random.split(key, 8)
    params = {}
    params["conv_stem"] = {"w": _conv_weight(ks[0], 16, 3, 3, 3)}
    s, b = _bn_params(16)
    params["bn1"] = {"scale": s, "shift": b}

    blocks = []
    for i, (cin, cout, _stride) in enumerate(_BLOCK_CFG):
        w = _conv_weight(ks[1 + i], cout, cin, 3, 3)
        s, b = _bn_params(cout)
        blocks.append({"w": w, "scale": s, "shift": b})
    params["blocks"] = blocks

    params["conv_head"] = {"w": _conv_weight(ks[5], 64, 48, 1, 1)}
    s, b = _bn_params(64)
    params["bn2"] = {"scale": s, "shift": b}
    return params


# ----------------------------------------------------------------------------
# Encoder.forward equivalent: a feature after every top-level module, and after
# every block inside `blocks` (matching the `k == 'blocks'` branch).
# ----------------------------------------------------------------------------
@jax.jit
def encoder_forward(params, x):
    features = [x]

    # conv_stem -> bn1 -> act1 (fused pass, all three features emitted)
    c, b, a = conv_bn_silu_stage(
        x, params["conv_stem"]["w"],
        params["bn1"]["scale"], params["bn1"]["shift"], stride=2, pad=1)
    features += [c, b, a]

    # blocks: each block appends its own feature
    h = a
    for blk, (_cin, _cout, stride) in zip(params["blocks"], _BLOCK_CFG):
        h = conv_bn_silu_block(h, blk["w"], blk["scale"], blk["shift"],
                               stride=stride, pad=1)
        features.append(h)

    # conv_head -> bn2 -> act2 (fused pass, all three features emitted)
    c, b, a = conv_bn_silu_stage(
        h, params["conv_head"]["w"],
        params["bn2"]["scale"], params["bn2"]["shift"], stride=1, pad=0)
    features += [c, b, a]
    return features


if __name__ == "__main__":
    key = jax.random.PRNGKey(0)
    pkey, xkey = jax.random.split(key)
    params = init_params(pkey)

    # NCHW input, small shapes: batch=2, channels=3, spatial=16
    x = jax.random.normal(xkey, (2, 3, 16, 16), jnp.float32)

    feats = encoder_forward(params, x)
    feats = jax.block_until_ready(feats)

    expected_shapes = [
        (2, 3, 16, 16),   # input
        (2, 16, 8, 8),    # conv_stem
        (2, 16, 8, 8),    # bn1
        (2, 16, 8, 8),    # act1
        (2, 24, 8, 8),    # block0
        (2, 32, 4, 4),    # block1
        (2, 48, 4, 4),    # block2
        (2, 64, 4, 4),    # conv_head
        (2, 64, 4, 4),    # bn2
        (2, 64, 4, 4),    # act2
    ]
    assert len(feats) == len(expected_shapes)
    for f, s in zip(feats, expected_shapes):
        assert f.shape == s, (f.shape, s)
        assert bool(jnp.all(jnp.isfinite(f)))

    print("KERNEL_OK")
</pallas_src>

<mosaic_0001>
module attributes {stable_mosaic.version = 11 : i64} {
  func.func @_conv_bn_silu_multi_kernel(%arg0: i32, %arg1: memref<2x32x128xbf16, #tpu.memory_space<vmem>>, %arg2: memref<16x32xbf16, #tpu.memory_space<vmem>>, %arg3: memref<16x1xf32, #tpu.memory_space<vmem>>, %arg4: memref<16x1xf32, #tpu.memory_space<vmem>>, %arg5: memref<2x16x128xf32, #tpu.memory_space<vmem>>, %arg6: memref<2x16x128xf32, #tpu.memory_space<vmem>>, %arg7: memref<2x16x128xf32, #tpu.memory_space<vmem>>) attributes {dimension_semantics = [#tpu.dimension_semantics<parallel>], iteration_bounds = array<i64: 1>, scalar_prefetch = 0 : i64, scratch_operands = 0 : i64, tpu.core_type = #tpu.core_type<tc>, window_params = [{transform_indices = @transform_0, window_bounds = array<i64: 2, 32, 128>}, {pipeline_mode = #tpu.pipeline_mode<synchronous>, transform_indices = @transform_1, window_bounds = array<i64: 16, 32>}, {pipeline_mode = #tpu.pipeline_mode<synchronous>, transform_indices = @transform_2, window_bounds = array<i64: 16, 1>}, {pipeline_mode = #tpu.pipeline_mode<synchronous>, transform_indices = @transform_3, window_bounds = array<i64: 16, 1>}, {transform_indices = @transform_4, window_bounds = array<i64: 2, 16, 128>}, {transform_indices = @transform_5, window_bounds = array<i64: 2, 16, 128>}, {transform_indices = @transform_6, window_bounds = array<i64: 2, 16, 128>}]} {
    %c0 = arith.constant 0 : index
    %c0_0 = arith.constant 0 : index
    %0 = vector.load %arg2[%c0, %c0_0] : memref<16x32xbf16, #tpu.memory_space<vmem>>, vector<16x32xbf16>
    %c0_1 = arith.constant 0 : index
    %c0_2 = arith.constant 0 : index
    %1 = vector.load %arg3[%c0_1, %c0_2] : memref<16x1xf32, #tpu.memory_space<vmem>>, vector<16x1xf32>
    %c0_3 = arith.constant 0 : index
    %c0_4 = arith.constant 0 : index
    %2 = vector.load %arg4[%c0_3, %c0_4] : memref<16x1xf32, #tpu.memory_space<vmem>>, vector<16x1xf32>
    %c0_5 = arith.constant 0 : index
    %c0_6 = arith.constant 0 : index
    %c0_7 = arith.constant 0 : index
    %3 = vector.load %arg1[%c0_5, %c0_6, %c0_7] : memref<2x32x128xbf16, #tpu.memory_space<vmem>>, vector<1x32x128xbf16>
    %4 = vector.shape_cast %3 : vector<1x32x128xbf16> to vector<32x128xbf16>
    %cst = arith.constant dense<0.000000e+00> : vector<16x128xf32>
    %5 = tpu.matmul %0, %4, %cst {dimension_numbers = #tpu.dot_dimension_numbers<[1], [0], [0], [1], [0, 0, 1, 1], [], []>} : vector<16x32xbf16>, vector<32x128xbf16>, vector<16x128xf32> -> vector<16x128xf32>
    %c0_8 = arith.constant 0 : index
    %c0_9 = arith.constant 0 : index
    %c0_10 = arith.constant 0 : index
    %6 = vector.load %arg5[%c0_8, %c0_9, %c0_10] : memref<2x16x128xf32, #tpu.memory_space<vmem>>, vector<1x16x128xf32>
    %7 = vector.shape_cast %6 : vector<1x16x128xf32> to vector<16x128xf32>
    %8 = vector.shape_cast %5 : vector<16x128xf32> to vector<1x16x128xf32>
    tpu.vector_store %arg5[%c0_8, %c0_9, %c0_10], %8 {strides = array<i32>} : memref<2x16x128xf32, #tpu.memory_space<vmem>>, vector<1x16x128xf32>,
    %9 = vector.broadcast %1 : vector<16x1xf32> to vector<16x128xf32>
    %10 = arith.mulf %5, %9 : vector<16x128xf32>
    %11 = vector.broadcast %2 : vector<16x1xf32> to vector<16x128xf32>
    %12 = arith.addf %10, %11 : vector<16x128xf32>
    %c0_11 = arith.constant 0 : index
    %c0_12 = arith.constant 0 : index
    %c0_13 = arith.constant 0 : index
    %13 = vector.load %arg6[%c0_11, %c0_12, %c0_13] : memref<2x16x128xf32, #tpu.memory_space<vmem>>, vector<1x16x128xf32>
    %14 = vector.shape_cast %13 : vector<1x16x128xf32> to vector<16x128xf32>
    %15 = vector.shape_cast %12 : vector<16x128xf32> to vector<1x16x128xf32>
    tpu.vector_store %arg6[%c0_11, %c0_12, %c0_13], %15 {strides = array<i32>} : memref<2x16x128xf32, #tpu.memory_space<vmem>>, vector<1x16x128xf32>,
    %cst_14 = arith.constant 0.000000e+00 : f32
    %16 = vector.broadcast %cst_14 : f32 to vector<16x128xf32>
    %17 = arith.subf %16, %12 : vector<16x128xf32>
    %18 = math.exp %17 : vector<16x128xf32>
    %cst_15 = arith.constant 1.000000e+00 : f32
    %19 = vector.broadcast %cst_15 : f32 to vector<16x128xf32>
    %20 = arith.addf %19, %18 : vector<16x128xf32>
    %21 = tpu.reciprocal %20 {approx = true} : vector<16x128xf32> -> vector<16x128xf32>
    %22 = arith.mulf %12, %21 : vector<16x128xf32>
    %c0_16 = arith.constant 0 : index
    %c0_17 = arith.constant 0 : index
    %c0_18 = arith.constant 0 : index
    %23 = vector.load %arg7[%c0_16, %c0_17, %c0_18] : memref<2x16x128xf32, #tpu.memory_space<vmem>>, vector<1x16x128xf32>
    %24 = vector.shape_cast %23 : vector<1x16x128xf32> to vector<16x128xf32>
    %25 = vector.shape_cast %22 : vector<16x128xf32> to vector<1x16x128xf32>
    tpu.vector_store %arg7[%c0_16, %c0_17, %c0_18], %25 {strides = array<i32>} : memref<2x16x128xf32, #tpu.memory_space<vmem>>, vector<1x16x128xf32>,
    %c1 = arith.constant 1 : index
    %c0_19 = arith.constant 0 : index
    %c0_20 = arith.constant 0 : index
    %26 = vector.load %arg1[%c1, %c0_19, %c0_20] : memref<2x32x128xbf16, #tpu.memory_space<vmem>>, vector<1x32x128xbf16>
    %27 = vector.shape_cast %26 : vector<1x32x128xbf16> to vector<32x128xbf16>
    %cst_21 = arith.constant dense<0.000000e+00> : vector<16x128xf32>
    %28 = tpu.matmul %0, %27, %cst_21 {dimension_numbers = #tpu.dot_dimension_numbers<[1], [0], [0], [1], [0, 0, 1, 1], [], []>} : vector<16x32xbf16>, vector<32x128xbf16>, vector<16x128xf32> -> vector<16x128xf32>
    %c1_22 = arith.constant 1 : index
    %c0_23 = arith.constant 0 : index
    %c0_24 = arith.constant 0 : index
    %29 = vector.load %arg5[%c1_22, %c0_23, %c0_24] : memref<2x16x128xf32, #tpu.memory_space<vmem>>, vector<1x16x128xf32>
    %30 = vector.shape_cast %29 : vector<1x16x128xf32> to vector<16x128xf32>
    %31 = vector.shape_cast %28 : vector<16x128xf32> to vector<1x16x128xf32>
    tpu.vector_store %arg5[%c1_22, %c0_23, %c0_24], %31 {strides = array<i32>} : memref<2x16x128xf32, #tpu.memory_space<vmem>>, vector<1x16x128xf32>,
    %32 = vector.broadcast %1 : vector<16x1xf32> to vector<16x128xf32>
    %33 = arith.mulf %28, %32 : vector<16x128xf32>
    %34 = vector.broadcast %2 : vector<16x1xf32> to vector<16x128xf32>
    %35 = arith.addf %33, %34 : vector<16x128xf32>
    %c1_25 = arith.constant 1 : index
    %c0_26 = arith.constant 0 : index
    %c0_27 = arith.constant 0 : index
    %36 = vector.load %arg6[%c1_25, %c0_26, %c0_27] : memref<2x16x128xf32, #tpu.memory_space<vmem>>, vector<1x16x128xf32>
    %37 = vector.shape_cast %36 : vector<1x16x128xf32> to vector<16x128xf32>
    %38 = vector.shape_cast %35 : vector<16x128xf32> to vector<1x16x128xf32>
    tpu.vector_store %arg6[%c1_25, %c0_26, %c0_27], %38 {strides = array<i32>} : memref<2x16x128xf32, #tpu.memory_space<vmem>>, vector<1x16x128xf32>,
    %cst_28 = arith.constant 0.000000e+00 : f32
    %39 = vector.broadcast %cst_28 : f32 to vector<16x128xf32>
    %40 = arith.subf %39, %35 : vector<16x128xf32>
    %41 = math.exp %40 : vector<16x128xf32>
    %cst_29 = arith.constant 1.000000e+00 : f32
    %42 = vector.broadcast %cst_29 : f32 to vector<16x128xf32>
    %43 = arith.addf %42, %41 : vector<16x128xf32>
    %44 = tpu.reciprocal %43 {approx = true} : vector<16x128xf32> -> vector<16x128xf32>
    %45 = arith.mulf %35, %44 : vector<16x128xf32>
    %c1_30 = arith.constant 1 : index
    %c0_31 = arith.constant 0 : index
    %c0_32 = arith.constant 0 : index
    %46 = vector.load %arg7[%c1_30, %c0_31, %c0_32] : memref<2x16x128xf32, #tpu.memory_space<vmem>>, vector<1x16x128xf32>
    %47 = vector.shape_cast %46 : vector<1x16x128xf32> to vector<16x128xf32>
    %48 = vector.shape_cast %45 : vector<16x128xf32> to vector<1x16x128xf32>
    tpu.vector_store %arg7[%c1_30, %c0_31, %c0_32], %48 {strides = array<i32>} : memref<2x16x128xf32, #tpu.memory_space<vmem>>, vector<1x16x128xf32>,
    return
  }
  func.func @transform_0(%arg0: i32) -> (i32, i32, i32) {
    %c0_i32 = arith.constant 0 : i32
    %c0_i32_0 = arith.constant 0 : i32
    %c0_i32_1 = arith.constant 0 : i32
    return %c0_i32, %c0_i32_0, %arg0 : i32, i32, i32
  }
  func.func @transform_1(%arg0: i32) -> (i32, i32) {
    %c0_i32 = arith.constant 0 : i32
    %c0_i32_0 = arith.constant 0 : i32
    %c0_i32_1 = arith.constant 0 : i32
    return %c0_i32, %c0_i32_0 : i32, i32
  }
  func.func @transform_2(%arg0: i32) -> (i32, i32) {
    %c0_i32 = arith.constant 0 : i32
    %c0_i32_0 = arith.constant 0 : i32
    %c0_i32_1 = arith.constant 0 : i32
    return %c0_i32, %c0_i32_0 : i32, i32
  }
  func.func @transform_3(%arg0: i32) -> (i32, i32) {
    %c0_i32 = arith.constant 0 : i32
    %c0_i32_0 = arith.constant 0 : i32
    %c0_i32_1 = arith.constant 0 : i32
    return %c0_i32, %c0_i32_0 : i32, i32
  }
  func.func @transform_4(%arg0: i32) -> (i32, i32, i32) {
    %c0_i32 = arith.constant 0 : i32
    %c0_i32_0 = arith.constant 0 : i32
    %c0_i32_1 = arith.constant 0 : i32
    return %c0_i32, %c0_i32_0, %arg0 : i32, i32, i32
  }
  func.func @transform_5(%arg0: i32) -> (i32, i32, i32) {
    %c0_i32 = arith.constant 0 : i32
    %c0_i32_0 = arith.constant 0 : i32
    %c0_i32_1 = arith.constant 0 : i32
    return %c0_i32, %c0_i32_0, %arg0 : i32, i32, i32
  }
  func.func @transform_6(%arg0: i32) -> (i32, i32, i32) {
    %c0_i32 = arith.constant 0 : i32
    %c0_i32_0 = arith.constant 0 : i32
    %c0_i32_1 = arith.constant 0 : i32
    return %c0_i32, %c0_i32_0, %arg0 : i32, i32, i32
  }
}

module attributes {stable_mosaic.version = 11 : i64} {
  func.func @_conv_bn_silu_kernel(%arg0: i32, %arg1: memref<2x144x128xbf16, #tpu.memory_space<vmem>>, %arg2: memref<24x144xbf16, #tpu.memory_space<vmem>>, %arg3: memref<24x1xf32, #tpu.memory_space<vmem>>, %arg4: memref<2x24x128xf32, #tpu.memory_space<vmem>>) attributes {dimension_semantics = [#tpu.dimension_semantics<parallel>], iteration_bounds = array<i64: 1>, scalar_prefetch = 0 : i64, scratch_operands = 0 : i64, tpu.core_type = #tpu.core_type<tc>, window_params = [{transform_indices = @transform_0, window_bounds = array<i64: 2, 144, 128>}, {pipeline_mode = #tpu.pipeline_mode<synchronous>, transform_indices = @transform_1, window_bounds = array<i64: 24, 144>}, {pipeline_mode = #tpu.pipeline_mode<synchronous>, transform_indices = @transform_2, window_bounds = array<i64: 24, 1>}, {transform_indices = @transform_3, window_bounds = array<i64: 2, 24, 128>}]} {
    %c0 = arith.constant 0 : index
    %c0_0 = arith.constant 0 : index
    %0 = vector.load %arg2[%c0, %c0_0] : memref<24x144xbf16, #tpu.memory_space<vmem>>, vector<24x144xbf16>
    %c0_1 = arith.constant 0 : index
    %c0_2 = arith.constant 0 : index
    %1 = vector.load %arg3[%c0_1, %c0_2] : memref<24x1xf32, #tpu.memory_space<vmem>>, vector<24x1xf32>
    %c0_3 = arith.constant 0 : index
    %c0_4 = arith.constant 0 : index
    %c0_5 = arith.constant 0 : index
    %2 = vector.load %arg1[%c0_3, %c0_4, %c0_5] : memref<2x144x128xbf16, #tpu.memory_space<vmem>>, vector<1x144x128xbf16>
    %3 = vector.shape_cast %2 : vector<1x144x128xbf16> to vector<144x128xbf16>
    %cst = arith.constant dense<0.000000e+00> : vector<24x128xf32>
    %4 = tpu.matmul %0, %3, %cst {dimension_numbers = #tpu.dot_dimension_numbers<[1], [0], [0], [1], [0, 0, 1, 1], [], []>} : vector<24x144xbf16>, vector<144x128xbf16>, vector<24x128xf32> -> vector<24x128xf32>
    %5 = vector.broadcast %1 : vector<24x1xf32> to vector<24x128xf32>
    %6 = arith.addf %4, %5 : vector<24x128xf32>
    %cst_6 = arith.constant 0.000000e+00 : f32
    %7 = vector.broadcast %cst_6 : f32 to vector<24x128xf32>
    %8 = arith.subf %7, %6 : vector<24x128xf32>
    %9 = math.exp %8 : vector<24x128xf32>
    %cst_7 = arith.constant 1.000000e+00 : f32
    %10 = vector.broadcast %cst_7 : f32 to vector<24x128xf32>
    %11 = arith.addf %10, %9 : vector<24x128xf32>
    %12 = tpu.reciprocal %11 {approx = true} : vector<24x128xf32> -> vector<24x128xf32>
    %13 = arith.mulf %6, %12 : vector<24x128xf32>
    %c0_8 = arith.constant 0 : index
    %c0_9 = arith.constant 0 : index
    %c0_10 = arith.constant 0 : index
    %14 = vector.load %arg4[%c0_8, %c0_9, %c0_10] : memref<2x24x128xf32, #tpu.memory_space<vmem>>, vector<1x24x128xf32>
    %15 = vector.shape_cast %14 : vector<1x24x128xf32> to vector<24x128xf32>
    %16 = vector.shape_cast %13 : vector<24x128xf32> to vector<1x24x128xf32>
    tpu.vector_store %arg4[%c0_8, %c0_9, %c0_10], %16 {strides = array<i32>} : memref<2x24x128xf32, #tpu.memory_space<vmem>>, vector<1x24x128xf32>,
    %c1 = arith.constant 1 : index
    %c0_11 = arith.constant 0 : index
    %c0_12 = arith.constant 0 : index
    %17 = vector.load %arg1[%c1, %c0_11, %c0_12] : memref<2x144x128xbf16, #tpu.memory_space<vmem>>, vector<1x144x128xbf16>
    %18 = vector.shape_cast %17 : vector<1x144x128xbf16> to vector<144x128xbf16>
    %cst_13 = arith.constant dense<0.000000e+00> : vector<24x128xf32>
    %19 = tpu.matmul %0, %18, %cst_13 {dimension_numbers = #tpu.dot_dimension_numbers<[1], [0], [0], [1], [0, 0, 1, 1], [], []>} : vector<24x144xbf16>, vector<144x128xbf16>, vector<24x128xf32> -> vector<24x128xf32>
    %20 = vector.broadcast %1 : vector<24x1xf32> to vector<24x128xf32>
    %21 = arith.addf %19, %20 : vector<24x128xf32>
    %cst_14 = arith.constant 0.000000e+00 : f32
    %22 = vector.broadcast %cst_14 : f32 to vector<24x128xf32>
    %23 = arith.subf %22, %21 : vector<24x128xf32>
    %24 = math.exp %23 : vector<24x128xf32>
    %cst_15 = arith.constant 1.000000e+00 : f32
    %25 = vector.broadcast %cst_15 : f32 to vector<24x128xf32>
    %26 = arith.addf %25, %24 : vector<24x128xf32>
    %27 = tpu.reciprocal %26 {approx = true} : vector<24x128xf32> -> vector<24x128xf32>
    %28 = arith.mulf %21, %27 : vector<24x128xf32>
    %c1_16 = arith.constant 1 : index
    %c0_17 = arith.constant 0 : index
    %c0_18 = arith.constant 0 : index
    %29 = vector.load %arg4[%c1_16, %c0_17, %c0_18] : memref<2x24x128xf32, #tpu.memory_space<vmem>>, vector<1x24x128xf32>
    %30 = vector.shape_cast %29 : vector<1x24x128xf32> to vector<24x128xf32>
    %31 = vector.shape_cast %28 : vector<24x128xf32> to vector<1x24x128xf32>
    tpu.vector_store %arg4[%c1_16, %c0_17, %c0_18], %31 {strides = array<i32>} : memref<2x24x128xf32, #tpu.memory_space<vmem>>, vector<1x24x128xf32>,
    return
  }
  func.func @transform_0(%arg0: i32) -> (i32, i32, i32) {
    %c0_i32 = arith.constant 0 : i32
    %c0_i32_0 = arith.constant 0 : i32
    %c0_i32_1 = arith.constant 0 : i32
    return %c0_i32, %c0_i32_0, %arg0 : i32, i32, i32
  }
  func.func @transform_1(%arg0: i32) -> (i32, i32) {
    %c0_i32 = arith.constant 0 : i32
    %c0_i32_0 = arith.constant 0 : i32
    %c0_i32_1 = arith.constant 0 : i32
    return %c0_i32, %c0_i32_0 : i32, i32
  }
  func.func @transform_2(%arg0: i32) -> (i32, i32) {
    %c0_i32 = arith.constant 0 : i32
    %c0_i32_0 = arith.constant 0 : i32
    %c0_i32_1 = arith.constant 0 : i32
    return %c0_i32, %c0_i32_0 : i32, i32
  }
  func.func @transform_3(%arg0: i32) -> (i32, i32, i32) {
    %c0_i32 = arith.constant 0 : i32
    %c0_i32_0 = arith.constant 0 : i32
    %c0_i32_1 = arith.constant 0 : i32
    return %c0_i32, %c0_i32_0, %arg0 : i32, i32, i32
  }
}

module attributes {stable_mosaic.version = 11 : i64} {
  func.func @_conv_bn_silu_kernel(%arg0: i32, %arg1: memref<2x224x128xbf16, #tpu.memory_space<vmem>>, %arg2: memref<32x224xbf16, #tpu.memory_space<vmem>>, %arg3: memref<32x1xf32, #tpu.memory_space<vmem>>, %arg4: memref<2x32x128xf32, #tpu.memory_space<vmem>>) attributes {dimension_semantics = [#tpu.dimension_semantics<parallel>], iteration_bounds = array<i64: 1>, scalar_prefetch = 0 : i64, scratch_operands = 0 : i64, tpu.core_type = #tpu.core_type<tc>, window_params = [{transform_indices = @transform_0, window_bounds = array<i64: 2, 224, 128>}, {pipeline_mode = #tpu.pipeline_mode<synchronous>, transform_indices = @transform_1, window_bounds = array<i64: 32, 224>}, {pipeline_mode = #tpu.pipeline_mode<synchronous>, transform_indices = @transform_2, window_bounds = array<i64: 32, 1>}, {transform_indices = @transform_3, window_bounds = array<i64: 2, 32, 128>}]} {
    %c0 = arith.constant 0 : index
    %c0_0 = arith.constant 0 : index
    %0 = vector.load %arg2[%c0, %c0_0] : memref<32x224xbf16, #tpu.memory_space<vmem>>, vector<32x224xbf16>
    %c0_1 = arith.constant 0 : index
    %c0_2 = arith.constant 0 : index
    %1 = vector.load %arg3[%c0_1, %c0_2] : memref<32x1xf32, #tpu.memory_space<vmem>>, vector<32x1xf32>
    %c0_3 = arith.constant 0 : index
    %c0_4 = arith.constant 0 : index
    %c0_5 = arith.constant 0 : index
    %2 = vector.load %arg1[%c0_3, %c0_4, %c0_5] : memref<2x224x128xbf16, #tpu.memory_space<vmem>>, vector<1x224x128xbf16>
    %3 = vector.shape_cast %2 : vector<1x224x128xbf16> to vector<224x128xbf16>
    %cst = arith.constant dense<0.000000e+00> : vector<32x128xf32>
    %4 = tpu.matmul %0, %3, %cst {dimension_numbers = #tpu.dot_dimension_numbers<[1], [0], [0], [1], [0, 0, 1, 1], [], []>} : vector<32x224xbf16>, vector<224x128xbf16>, vector<32x128xf32> -> vector<32x128xf32>
    %5 = vector.broadcast %1 : vector<32x1xf32> to vector<32x128xf32>
    %6 = arith.addf %4, %5 : vector<32x128xf32>
    %cst_6 = arith.constant 0.000000e+00 : f32
    %7 = vector.broadcast %cst_6 : f32 to vector<32x128xf32>
    %8 = arith.subf %7, %6 : vector<32x128xf32>
    %9 = math.exp %8 : vector<32x128xf32>
    %cst_7 = arith.constant 1.000000e+00 : f32
    %10 = vector.broadcast %cst_7 : f32 to vector<32x128xf32>
    %11 = arith.addf %10, %9 : vector<32x128xf32>
    %12 = tpu.reciprocal %11 {approx = true} : vector<32x128xf32> -> vector<32x128xf32>
    %13 = arith.mulf %6, %12 : vector<32x128xf32>
    %c0_8 = arith.constant 0 : index
    %c0_9 = arith.constant 0 : index
    %c0_10 = arith.constant 0 : index
    %14 = vector.load %arg4[%c0_8, %c0_9, %c0_10] : memref<2x32x128xf32, #tpu.memory_space<vmem>>, vector<1x32x128xf32>
    %15 = vector.shape_cast %14 : vector<1x32x128xf32> to vector<32x128xf32>
    %16 = vector.shape_cast %13 : vector<32x128xf32> to vector<1x32x128xf32>
    tpu.vector_store %arg4[%c0_8, %c0_9, %c0_10], %16 {strides = array<i32>} : memref<2x32x128xf32, #tpu.memory_space<vmem>>, vector<1x32x128xf32>,
    %c1 = arith.constant 1 : index
    %c0_11 = arith.constant 0 : index
    %c0_12 = arith.constant 0 : index
    %17 = vector.load %arg1[%c1, %c0_11, %c0_12] : memref<2x224x128xbf16, #tpu.memory_space<vmem>>, vector<1x224x128xbf16>
    %18 = vector.shape_cast %17 : vector<1x224x128xbf16> to vector<224x128xbf16>
    %cst_13 = arith.constant dense<0.000000e+00> : vector<32x128xf32>
    %19 = tpu.matmul %0, %18, %cst_13 {dimension_numbers = #tpu.dot_dimension_numbers<[1], [0], [0], [1], [0, 0, 1, 1], [], []>} : vector<32x224xbf16>, vector<224x128xbf16>, vector<32x128xf32> -> vector<32x128xf32>
    %20 = vector.broadcast %1 : vector<32x1xf32> to vector<32x128xf32>
    %21 = arith.addf %19, %20 : vector<32x128xf32>
    %cst_14 = arith.constant 0.000000e+00 : f32
    %22 = vector.broadcast %cst_14 : f32 to vector<32x128xf32>
    %23 = arith.subf %22, %21 : vector<32x128xf32>
    %24 = math.exp %23 : vector<32x128xf32>
    %cst_15 = arith.constant 1.000000e+00 : f32
    %25 = vector.broadcast %cst_15 : f32 to vector<32x128xf32>
    %26 = arith.addf %25, %24 : vector<32x128xf32>
    %27 = tpu.reciprocal %26 {approx = true} : vector<32x128xf32> -> vector<32x128xf32>
    %28 = arith.mulf %21, %27 : vector<32x128xf32>
    %c1_16 = arith.constant 1 : index
    %c0_17 = arith.constant 0 : index
    %c0_18 = arith.constant 0 : index
    %29 = vector.load %arg4[%c1_16, %c0_17, %c0_18] : memref<2x32x128xf32, #tpu.memory_space<vmem>>, vector<1x32x128xf32>
    %30 = vector.shape_cast %29 : vector<1x32x128xf32> to vector<32x128xf32>
    %31 = vector.shape_cast %28 : vector<32x128xf32> to vector<1x32x128xf32>
    tpu.vector_store %arg4[%c1_16, %c0_17, %c0_18], %31 {strides = array<i32>} : memref<2x32x128xf32, #tpu.memory_space<vmem>>, vector<1x32x128xf32>,
    return
  }
  func.func @transform_0(%arg0: i32) -> (i32, i32, i32) {
    %c0_i32 = arith.constant 0 : i32
    %c0_i32_0 = arith.constant 0 : i32
    %c0_i32_1 = arith.constant 0 : i32
    return %c0_i32, %c0_i32_0, %arg0 : i32, i32, i32
  }
  func.func @transform_1(%arg0: i32) -> (i32, i32) {
    %c0_i32 = arith.constant 0 : i32
    %c0_i32_0 = arith.constant 0 : i32
    %c0_i32_1 = arith.constant 0 : i32
    return %c0_i32, %c0_i32_0 : i32, i32
  }
  func.func @transform_2(%arg0: i32) -> (i32, i32) {
    %c0_i32 = arith.constant 0 : i32
    %c0_i32_0 = arith.constant 0 : i32
    %c0_i32_1 = arith.constant 0 : i32
    return %c0_i32, %c0_i32_0 : i32, i32
  }
  func.func @transform_3(%arg0: i32) -> (i32, i32, i32) {
    %c0_i32 = arith.constant 0 : i32
    %c0_i32_0 = arith.constant 0 : i32
    %c0_i32_1 = arith.constant 0 : i32
    return %c0_i32, %c0_i32_0, %arg0 : i32, i32, i32
  }
}

module attributes {stable_mosaic.version = 11 : i64} {
  func.func @_conv_bn_silu_kernel(%arg0: i32, %arg1: memref<2x288x128xbf16, #tpu.memory_space<vmem>>, %arg2: memref<48x288xbf16, #tpu.memory_space<vmem>>, %arg3: memref<48x1xf32, #tpu.memory_space<vmem>>, %arg4: memref<2x48x128xf32, #tpu.memory_space<vmem>>) attributes {dimension_semantics = [#tpu.dimension_semantics<parallel>], iteration_bounds = array<i64: 1>, scalar_prefetch = 0 : i64, scratch_operands = 0 : i64, tpu.core_type = #tpu.core_type<tc>, window_params = [{transform_indices = @transform_0, window_bounds = array<i64: 2, 288, 128>}, {pipeline_mode = #tpu.pipeline_mode<synchronous>, transform_indices = @transform_1, window_bounds = array<i64: 48, 288>}, {pipeline_mode = #tpu.pipeline_mode<synchronous>, transform_indices = @transform_2, window_bounds = array<i64: 48, 1>}, {transform_indices = @transform_3, window_bounds = array<i64: 2, 48, 128>}]} {
    %c0 = arith.constant 0 : index
    %c0_0 = arith.constant 0 : index
    %0 = vector.load %arg2[%c0, %c0_0] : memref<48x288xbf16, #tpu.memory_space<vmem>>, vector<48x288xbf16>
    %c0_1 = arith.constant 0 : index
    %c0_2 = arith.constant 0 : index
    %1 = vector.load %arg3[%c0_1, %c0_2] : memref<48x1xf32, #tpu.memory_space<vmem>>, vector<48x1xf32>
    %c0_3 = arith.constant 0 : index
    %c0_4 = arith.constant 0 : index
    %c0_5 = arith.constant 0 : index
    %2 = vector.load %arg1[%c0_3, %c0_4, %c0_5] : memref<2x288x128xbf16, #tpu.memory_space<vmem>>, vector<1x288x128xbf16>
    %3 = vector.shape_cast %2 : vector<1x288x128xbf16> to vector<288x128xbf16>
    %cst = arith.constant dense<0.000000e+00> : vector<48x128xf32>
    %4 = tpu.matmul %0, %3, %cst {dimension_numbers = #tpu.dot_dimension_numbers<[1], [0], [0], [1], [0, 0, 1, 1], [], []>} : vector<48x288xbf16>, vector<288x128xbf16>, vector<48x128xf32> -> vector<48x128xf32>
    %5 = vector.broadcast %1 : vector<48x1xf32> to vector<48x128xf32>
    %6 = arith.addf %4, %5 : vector<48x128xf32>
    %cst_6 = arith.constant 0.000000e+00 : f32
    %7 = vector.broadcast %cst_6 : f32 to vector<48x128xf32>
    %8 = arith.subf %7, %6 : vector<48x128xf32>
    %9 = math.exp %8 : vector<48x128xf32>
    %cst_7 = arith.constant 1.000000e+00 : f32
    %10 = vector.broadcast %cst_7 : f32 to vector<48x128xf32>
    %11 = arith.addf %10, %9 : vector<48x128xf32>
    %12 = tpu.reciprocal %11 {approx = true} : vector<48x128xf32> -> vector<48x128xf32>
    %13 = arith.mulf %6, %12 : vector<48x128xf32>
    %c0_8 = arith.constant 0 : index
    %c0_9 = arith.constant 0 : index
    %c0_10 = arith.constant 0 : index
    %14 = vector.load %arg4[%c0_8, %c0_9, %c0_10] : memref<2x48x128xf32, #tpu.memory_space<vmem>>, vector<1x48x128xf32>
    %15 = vector.shape_cast %14 : vector<1x48x128xf32> to vector<48x128xf32>
    %16 = vector.shape_cast %13 : vector<48x128xf32> to vector<1x48x128xf32>
    tpu.vector_store %arg4[%c0_8, %c0_9, %c0_10], %16 {strides = array<i32>} : memref<2x48x128xf32, #tpu.memory_space<vmem>>, vector<1x48x128xf32>,
    %c1 = arith.constant 1 : index
    %c0_11 = arith.constant 0 : index
    %c0_12 = arith.constant 0 : index
    %17 = vector.load %arg1[%c1, %c0_11, %c0_12] : memref<2x288x128xbf16, #tpu.memory_space<vmem>>, vector<1x288x128xbf16>
    %18 = vector.shape_cast %17 : vector<1x288x128xbf16> to vector<288x128xbf16>
    %cst_13 = arith.constant dense<0.000000e+00> : vector<48x128xf32>
    %19 = tpu.matmul %0, %18, %cst_13 {dimension_numbers = #tpu.dot_dimension_numbers<[1], [0], [0], [1], [0, 0, 1, 1], [], []>} : vector<48x288xbf16>, vector<288x128xbf16>, vector<48x128xf32> -> vector<48x128xf32>
    %20 = vector.broadcast %1 : vector<48x1xf32> to vector<48x128xf32>
    %21 = arith.addf %19, %20 : vector<48x128xf32>
    %cst_14 = arith.constant 0.000000e+00 : f32
    %22 = vector.broadcast %cst_14 : f32 to vector<48x128xf32>
    %23 = arith.subf %22, %21 : vector<48x128xf32>
    %24 = math.exp %23 : vector<48x128xf32>
    %cst_15 = arith.constant 1.000000e+00 : f32
    %25 = vector.broadcast %cst_15 : f32 to vector<48x128xf32>
    %26 = arith.addf %25, %24 : vector<48x128xf32>
    %27 = tpu.reciprocal %26 {approx = true} : vector<48x128xf32> -> vector<48x128xf32>
    %28 = arith.mulf %21, %27 : vector<48x128xf32>
    %c1_16 = arith.constant 1 : index
    %c0_17 = arith.constant 0 : index
    %c0_18 = arith.constant 0 : index
    %29 = vector.load %arg4[%c1_16, %c0_17, %c0_18] : memref<2x48x128xf32, #tpu.memory_space<vmem>>, vector<1x48x128xf32>
    %30 = vector.shape_cast %29 : vector<1x48x128xf32> to vector<48x128xf32>
    %31 = vector.shape_cast %28 : vector<48x128xf32> to vector<1x48x128xf32>
    tpu.vector_store %arg4[%c1_16, %c0_17, %c0_18], %31 {strides = array<i32>} : memref<2x48x128xf32, #tpu.memory_space<vmem>>, vector<1x48x128xf32>,
    return
  }
  func.func @transform_0(%arg0: i32) -> (i32, i32, i32) {
    %c0_i32 = arith.constant 0 : i32
    %c0_i32_0 = arith.constant 0 : i32
    %c0_i32_1 = arith.constant 0 : i32
    return %c0_i32, %c0_i32_0, %arg0 : i32, i32, i32
  }
  func.func @transform_1(%arg0: i32) -> (i32, i32) {
    %c0_i32 = arith.constant 0 : i32
    %c0_i32_0 = arith.constant 0 : i32
    %c0_i32_1 = arith.constant 0 : i32
    return %c0_i32, %c0_i32_0 : i32, i32
  }
  func.func @transform_2(%arg0: i32) -> (i32, i32) {
    %c0_i32 = arith.constant 0 : i32
    %c0_i32_0 = arith.constant 0 : i32
    %c0_i32_1 = arith.constant 0 : i32
    return %c0_i32, %c0_i32_0 : i32, i32
  }
  func.func @transform_3(%arg0: i32) -> (i32, i32, i32) {
    %c0_i32 = arith.constant 0 : i32
    %c0_i32_0 = arith.constant 0 : i32
    %c0_i32_1 = arith.constant 0 : i32
    return %c0_i32, %c0_i32_0, %arg0 : i32, i32, i32
  }
}

module attributes {stable_mosaic.version = 11 : i64} {
  func.func @_conv_bn_silu_multi_kernel(%arg0: i32, %arg1: memref<2x48x128xbf16, #tpu.memory_space<vmem>>, %arg2: memref<64x48xbf16, #tpu.memory_space<vmem>>, %arg3: memref<64x1xf32, #tpu.memory_space<vmem>>, %arg4: memref<64x1xf32, #tpu.memory_space<vmem>>, %arg5: memref<2x64x128xf32, #tpu.memory_space<vmem>>, %arg6: memref<2x64x128xf32, #tpu.memory_space<vmem>>, %arg7: memref<2x64x128xf32, #tpu.memory_space<vmem>>) attributes {dimension_semantics = [#tpu.dimension_semantics<parallel>], iteration_bounds = array<i64: 1>, scalar_prefetch = 0 : i64, scratch_operands = 0 : i64, tpu.core_type = #tpu.core_type<tc>, window_params = [{transform_indices = @transform_0, window_bounds = array<i64: 2, 48, 128>}, {pipeline_mode = #tpu.pipeline_mode<synchronous>, transform_indices = @transform_1, window_bounds = array<i64: 64, 48>}, {pipeline_mode = #tpu.pipeline_mode<synchronous>, transform_indices = @transform_2, window_bounds = array<i64: 64, 1>}, {pipeline_mode = #tpu.pipeline_mode<synchronous>, transform_indices = @transform_3, window_bounds = array<i64: 64, 1>}, {transform_indices = @transform_4, window_bounds = array<i64: 2, 64, 128>}, {transform_indices = @transform_5, window_bounds = array<i64: 2, 64, 128>}, {transform_indices = @transform_6, window_bounds = array<i64: 2, 64, 128>}]} {
    %c0 = arith.constant 0 : index
    %c0_0 = arith.constant 0 : index
    %0 = vector.load %arg2[%c0, %c0_0] : memref<64x48xbf16, #tpu.memory_space<vmem>>, vector<64x48xbf16>
    %c0_1 = arith.constant 0 : index
    %c0_2 = arith.constant 0 : index
    %1 = vector.load %arg3[%c0_1, %c0_2] : memref<64x1xf32, #tpu.memory_space<vmem>>, vector<64x1xf32>
    %c0_3 = arith.constant 0 : index
    %c0_4 = arith.constant 0 : index
    %2 = vector.load %arg4[%c0_3, %c0_4] : memref<64x1xf32, #tpu.memory_space<vmem>>, vector<64x1xf32>
    %c0_5 = arith.constant 0 : index
    %c0_6 = arith.constant 0 : index
    %c0_7 = arith.constant 0 : index
    %3 = vector.load %arg1[%c0_5, %c0_6, %c0_7] : memref<2x48x128xbf16, #tpu.memory_space<vmem>>, vector<1x48x128xbf16>
    %4 = vector.shape_cast %3 : vector<1x48x128xbf16> to vector<48x128xbf16>
    %cst = arith.constant dense<0.000000e+00> : vector<64x128xf32>
    %5 = tpu.matmul %0, %4, %cst {dimension_numbers = #tpu.dot_dimension_numbers<[1], [0], [0], [1], [0, 0, 1, 1], [], []>} : vector<64x48xbf16>, vector<48x128xbf16>, vector<64x128xf32> -> vector<64x128xf32>
    %c0_8 = arith.constant 0 : index
    %c0_9 = arith.constant 0 : index
    %c0_10 = arith.constant 0 : index
    %6 = vector.load %arg5[%c0_8, %c0_9, %c0_10] : memref<2x64x128xf32, #tpu.memory_space<vmem>>, vector<1x64x128xf32>
    %7 = vector.shape_cast %6 : vector<1x64x128xf32> to vector<64x128xf32>
    %8 = vector.shape_cast %5 : vector<64x128xf32> to vector<1x64x128xf32>
    tpu.vector_store %arg5[%c0_8, %c0_9, %c0_10], %8 {strides = array<i32>} : memref<2x64x128xf32, #tpu.memory_space<vmem>>, vector<1x64x128xf32>,
    %9 = vector.broadcast %1 : vector<64x1xf32> to vector<64x128xf32>
    %10 = arith.mulf %5, %9 : vector<64x128xf32>
    %11 = vector.broadcast %2 : vector<64x1xf32> to vector<64x128xf32>
    %12 = arith.addf %10, %11 : vector<64x128xf32>
    %c0_11 = arith.constant 0 : index
    %c0_12 = arith.constant 0 : index
    %c0_13 = arith.constant 0 : index
    %13 = vector.load %arg6[%c0_11, %c0_12, %c0_13] : memref<2x64x128xf32, #tpu.memory_space<vmem>>, vector<1x64x128xf32>
    %14 = vector.shape_cast %13 : vector<1x64x128xf32> to vector<64x128xf32>
    %15 = vector.shape_cast %12 : vector<64x128xf32> to vector<1x64x128xf32>
    tpu.vector_store %arg6[%c0_11, %c0_12, %c0_13], %15 {strides = array<i32>} : memref<2x64x128xf32, #tpu.memory_space<vmem>>, vector<1x64x128xf32>,
    %cst_14 = arith.constant 0.000000e+00 : f32
    %16 = vector.broadcast %cst_14 : f32 to vector<64x128xf32>
    %17 = arith.subf %16, %12 : vector<64x128xf32>
    %18 = math.exp %17 : vector<64x128xf32>
    %cst_15 = arith.constant 1.000000e+00 : f32
    %19 = vector.broadcast %cst_15 : f32 to vector<64x128xf32>
    %20 = arith.addf %19, %18 : vector<64x128xf32>
    %21 = tpu.reciprocal %20 {approx = true} : vector<64x128xf32> -> vector<64x128xf32>
    %22 = arith.mulf %12, %21 : vector<64x128xf32>
    %c0_16 = arith.constant 0 : index
    %c0_17 = arith.constant 0 : index
    %c0_18 = arith.constant 0 : index
    %23 = vector.load %arg7[%c0_16, %c0_17, %c0_18] : memref<2x64x128xf32, #tpu.memory_space<vmem>>, vector<1x64x128xf32>
    %24 = vector.shape_cast %23 : vector<1x64x128xf32> to vector<64x128xf32>
    %25 = vector.shape_cast %22 : vector<64x128xf32> to vector<1x64x128xf32>
    tpu.vector_store %arg7[%c0_16, %c0_17, %c0_18], %25 {strides = array<i32>} : memref<2x64x128xf32, #tpu.memory_space<vmem>>, vector<1x64x128xf32>,
    %c1 = arith.constant 1 : index
    %c0_19 = arith.constant 0 : index
    %c0_20 = arith.constant 0 : index
    %26 = vector.load %arg1[%c1, %c0_19, %c0_20] : memref<2x48x128xbf16, #tpu.memory_space<vmem>>, vector<1x48x128xbf16>
    %27 = vector.shape_cast %26 : vector<1x48x128xbf16> to vector<48x128xbf16>
    %cst_21 = arith.constant dense<0.000000e+00> : vector<64x128xf32>
    %28 = tpu.matmul %0, %27, %cst_21 {dimension_numbers = #tpu.dot_dimension_numbers<[1], [0], [0], [1], [0, 0, 1, 1], [], []>} : vector<64x48xbf16>, vector<48x128xbf16>, vector<64x128xf32> -> vector<64x128xf32>
    %c1_22 = arith.constant 1 : index
    %c0_23 = arith.constant 0 : index
    %c0_24 = arith.constant 0 : index
    %29 = vector.load %arg5[%c1_22, %c0_23, %c0_24] : memref<2x64x128xf32, #tpu.memory_space<vmem>>, vector<1x64x128xf32>
    %30 = vector.shape_cast %29 : vector<1x64x128xf32> to vector<64x128xf32>
    %31 = vector.shape_cast %28 : vector<64x128xf32> to vector<1x64x128xf32>
    tpu.vector_store %arg5[%c1_22, %c0_23, %c0_24], %31 {strides = array<i32>} : memref<2x64x128xf32, #tpu.memory_space<vmem>>, vector<1x64x128xf32>,
    %32 = vector.broadcast %1 : vector<64x1xf32> to vector<64x128xf32>
    %33 = arith.mulf %28, %32 : vector<64x128xf32>
    %34 = vector.broadcast %2 : vector<64x1xf32> to vector<64x128xf32>
    %35 = arith.addf %33, %34 : vector<64x128xf32>
    %c1_25 = arith.constant 1 : index
    %c0_26 = arith.constant 0 : index
    %c0_27 = arith.constant 0 : index
    %36 = vector.load %arg6[%c1_25, %c0_26, %c0_27] : memref<2x64x128xf32, #tpu.memory_space<vmem>>, vector<1x64x128xf32>
    %37 = vector.shape_cast %36 : vector<1x64x128xf32> to vector<64x128xf32>
    %38 = vector.shape_cast %35 : vector<64x128xf32> to vector<1x64x128xf32>
    tpu.vector_store %arg6[%c1_25, %c0_26, %c0_27], %38 {strides = array<i32>} : memref<2x64x128xf32, #tpu.memory_space<vmem>>, vector<1x64x128xf32>,
    %cst_28 = arith.constant 0.000000e+00 : f32
    %39 = vector.broadcast %cst_28 : f32 to vector<64x128xf32>
    %40 = arith.subf %39, %35 : vector<64x128xf32>
    %41 = math.exp %40 : vector<64x128xf32>
    %cst_29 = arith.constant 1.000000e+00 : f32
    %42 = vector.broadcast %cst_29 : f32 to vector<64x128xf32>
    %43 = arith.addf %42, %41 : vector<64x128xf32>
    %44 = tpu.reciprocal %43 {approx = true} : vector<64x128xf32> -> vector<64x128xf32>
    %45 = arith.mulf %35, %44 : vector<64x128xf32>
    %c1_30 = arith.constant 1 : index
    %c0_31 = arith.constant 0 : index
    %c0_32 = arith.constant 0 : index
    %46 = vector.load %arg7[%c1_30, %c0_31, %c0_32] : memref<2x64x128xf32, #tpu.memory_space<vmem>>, vector<1x64x128xf32>
    %47 = vector.shape_cast %46 : vector<1x64x128xf32> to vector<64x128xf32>
    %48 = vector.shape_cast %45 : vector<64x128xf32> to vector<1x64x128xf32>
    tpu.vector_store %arg7[%c1_30, %c0_31, %c0_32], %48 {strides = array<i32>} : memref<2x64x128xf32, #tpu.memory_space<vmem>>, vector<1x64x128xf32>,
    return
  }
  func.func @transform_0(%arg0: i32) -> (i32, i32, i32) {
    %c0_i32 = arith.constant 0 : i32
    %c0_i32_0 = arith.constant 0 : i32
    %c0_i32_1 = arith.constant 0 : i32
    return %c0_i32, %c0_i32_0, %arg0 : i32, i32, i32
  }
  func.func @transform_1(%arg0: i32) -> (i32, i32) {
    %c0_i32 = arith.constant 0 : i32
    %c0_i32_0 = arith.constant 0 : i32
    %c0_i32_1 = arith.constant 0 : i32
    return %c0_i32, %c0_i32_0 : i32, i32
  }
  func.func @transform_2(%arg0: i32) -> (i32, i32) {
    %c0_i32 = arith.constant 0 : i32
    %c0_i32_0 = arith.constant 0 : i32
    %c0_i32_1 = arith.constant 0 : i32
    return %c0_i32, %c0_i32_0 : i32, i32
  }
  func.func @transform_3(%arg0: i32) -> (i32, i32) {
    %c0_i32 = arith.constant 0 : i32
    %c0_i32_0 = arith.constant 0 : i32
    %c0_i32_1 = arith.constant 0 : i32
    return %c0_i32, %c0_i32_0 : i32, i32
  }
  func.func @transform_4(%arg0: i32) -> (i32, i32, i32) {
    %c0_i32 = arith.constant 0 : i32
    %c0_i32_0 = arith.constant 0 : i32
    %c0_i32_1 = arith.constant 0 : i32
    return %c0_i32, %c0_i32_0, %arg0 : i32, i32, i32
  }
  func.func @transform_5(%arg0: i32) -> (i32, i32, i32) {
    %c0_i32 = arith.constant 0 : i32
    %c0_i32_0 = arith.constant 0 : i32
    %c0_i32_1 = arith.constant 0 : i32
    return %c0_i32, %c0_i32_0, %arg0 : i32, i32, i32
  }
  func.func @transform_6(%arg0: i32) -> (i32, i32, i32) {
    %c0_i32 = arith.constant 0 : i32
    %c0_i32_0 = arith.constant 0 : i32
    %c0_i32_1 = arith.constant 0 : i32
    return %c0_i32, %c0_i32_0, %arg0 : i32, i32, i32
  }
}

</mosaic_0001>

<bundles_post_ra>
// kernel: encoder_forward.5
= control target key start
LH: loop header
LB: loop body
LE: loop exit
PB: predicated region body
PF: predicated region fallthrough
CT: control target
= control target key end

     0   :  { %v232_v2 = vmov 0   ;;  %vm48_vm0 = vcmask 261120   ;;  %s331_s0 = inlined_call_operand.vmem [shape: bf16[2,32,128], index: 0, kind: input, shape index: {}]   ;;  %s332_s2 = inlined_call_operand.vmem [shape: f32[16,1], index: 2, kind: input, shape index: {}]   ;;  %s333_s3 = inlined_call_operand.vmem [shape: f32[16,1], index: 3, kind: input, shape index: {}]   ;;  %s334_s1 = inlined_call_operand.vmem [shape: bf16[16,32], index: 1, kind: input, shape index: {}]   ;;  %s335_s4 = inlined_call_operand.vmem [shape: f32[2,16,128], index: 4, kind: output, shape index: {0}]   ;;  %s336_s5 = inlined_call_operand.vmem [shape: f32[2,16,128], index: 5, kind: output, shape index: {1}]   ;;  %s337_s6 = inlined_call_operand.vmem [shape: f32[2,16,128], index: 6, kind: output, shape index: {2}]  }
   0x1   :  { %v210_v0 = vld [vmem:[%s331_s0 + $0x8] sm:$0xff]  ;;  %v212_v1 = vld [vmem:[%s331_s0 + $0x18] sm:$0xff]  ;;  %214 = vset.pattern.permute.xlu0 %v232_v2  ;;  %215 = vset.pattern.permute.xlu1 %v232_v2  ;;  %v23_v3 = vld [vmem:[%s332_s2] sm:$0xff] }
   0x2   :  { %58 = vmatpush.bf16.msra.mxu0 %v210_v0  ;;  %131 = vmatpush.bf16.msra.mxu1 %v212_v1  ;;  %v209_v4 = vld [vmem:[%s331_s0] sm:$0xff]  ;;  %v211_v5 = vld [vmem:[%s331_s0 + $0x10] sm:$0xff]  ;;  %v24_v8 = vld [vmem:[%s332_s2 + $0x8] sm:$0xff] }
   0x3   :  { %v25_v6 = vld [vmem:[%s333_s3] sm:$0xff]  ;;  %70 = vperm.xlu0 %214, %v23_v3   ;;  %v26_v9 = vld [vmem:[%s333_s3 + $0x8] sm:$0xff] }
   0x4   :  { %82 = vperm.xlu1 %215, %v25_v6   ;;  %v208_v7 = vld [vmem:[%s334_s1] sm:$0xff] }
   0x6   :  { %59 = vmatpush.bf16.msra.mxu0 %v209_v4  ;;  %132 = vmatpush.bf16.msra.mxu1 %v211_v5 }
   0x9   :  { %188 = vmatmul.msk.bf16.vlgmr.msra.gmra.mxu0 %vm48_vm0, %v208_v7  ;;  %201 = vmatmul.msk.bf16.vlgmr.msra.gmra.mxu1 %vm48_vm0, %v208_v7 }
   0xb   :  { %75 = vperm.xlu0 %214, %v24_v8  }
   0xc   :  { %87 = vperm.xlu1 %215, %v26_v9  }
  0x75   :  { %v71_v10 = vpop.permute.xlu0 %70 }
  0x76   :  { %v83_v11 = vpop.permute.xlu1 %82 }
  0x7d   :  { %v76_v20 = vpop.permute.xlu0 %75 }
  0x7e   :  { %v88_v27 = vpop.permute.xlu1 %87 }
  0x86   :  { %v61_v12 = vpop.f32.mrf.mxu0  ;;  %v134_v13 = vpop.f32.mrf.mxu1 }
  0x87   :  { %66 = vst [vmem:[%s335_s4] sm:$0xff] %v61_v12  ;;  %v78_v14 = vmul.f32 %v71_v10, %v61_v12  ;;  %v142_v15 = vmul.f32 %v134_v13, %v71_v10 }
  0x88   :  { %202 = vst [vmem:[%s335_s4 + $0x10] sm:$0xff] %v134_v13 }
  0x89   :  { %v90_v16 = vadd.f32 %v83_v11, %v78_v14  ;;  %v144_v17 = vadd.f32 %v142_v15, %v83_v11 }
  0x8b   :  { %92 = vst [vmem:[%s336_s5] sm:$0xff] %v90_v16  ;;  %v94_v18 = vsub.f32 0.0, %v90_v16  ;;  %v149_v19 = vsub.f32 0.0, %v144_v17 }
  0x8c   :  { %204 = vst [vmem:[%s336_s5 + $0x10] sm:$0xff] %v144_v17 }
  0x8d   :  { %v96_v21 = vmul.f32 1.442695, %v94_v18  ;;  %v151_v22 = vmul.f32 1.442695, %v149_v19 }
  0x8e   :  { %v63_v23 = vpop.f32.mrf.mxu0  ;;  %v136_v24 = vpop.f32.mrf.mxu1 }
  0x8f   :  { %216 = vpow2.f32 %v96_v21  ;;  %67 = vst [vmem:[%s335_s4 + $0x8] sm:$0xff] %v63_v23  ;;  %v79_v25 = vmul.f32 %v76_v20, %v63_v23  ;;  %v143_v26 = vmul.f32 %v136_v24, %v76_v20 }
  0x90   :  { %218 = vpow2.f32 %v151_v22  ;;  %203 = vst [vmem:[%s335_s4 + $0x18] sm:$0xff] %v136_v24 }
  0x91   :  { %v91_v28 = vadd.f32 %v88_v27, %v79_v25  ;;  %v145_v29 = vadd.f32 %v143_v26, %v88_v27 }
  0x93   :  { %93 = vst [vmem:[%s336_s5 + $0x8] sm:$0xff] %v91_v28  ;;  %v95_v30 = vsub.f32 0.0, %v91_v28  ;;  %v150_v31 = vsub.f32 0.0, %v145_v29 }
  0x94   :  { %205 = vst [vmem:[%s336_s5 + $0x18] sm:$0xff] %v145_v29 }
  0x95   :  { %v217_v32 = vpop.eup %216  ;;  %v98_v33 = vmul.f32 1.442695, %v95_v30  ;;  %v153_v36 = vmul.f32 1.442695, %v150_v31 }
  0x96   :  { %v219_v34 = vpop.eup %218  ;;  %v100_v35 = vadd.f32 1.0, %v217_v32 }
  0x97   :  { %v155_v37 = vadd.f32 1.0, %v219_v34  ;;  %220 = vpow2.f32 %v98_v33 }
  0x98   :  { %222 = vrcp.f32 %v100_v35 }
  0x99   :  { %224 = vrcp.f32 %v155_v37 }
  0x9a   :  { %226 = vpow2.f32 %v153_v36 }
  0x9d   :  { %v221_v38 = vpop.eup %220 }
  0x9e   :  { %v223_v39 = vpop.eup %222  ;;  %v101_v40 = vadd.f32 1.0, %v221_v38 }
  0x9f   :  { %v225_v41 = vpop.eup %224  ;;  %v104_v42 = vmul.f32 %v223_v39, %v90_v16 }
  0xa0   :  { %v227_v43 = vpop.eup %226  ;;  %v159_v44 = vmul.f32 %v225_v41, %v144_v17  ;;  %228 = vrcp.f32 %v101_v40 }
  0xa1   :  { %106 = vst [vmem:[%s337_s6] sm:$0xff] %v104_v42  ;;  %v156_v45 = vadd.f32 1.0, %v227_v43 }
  0xa2   :  { %206 = vst [vmem:[%s337_s6 + $0x10] sm:$0xff] %v159_v44 }
  0xa3   :  { %230 = vrcp.f32 %v156_v45 }
  0xa6   :  { %v229_v46 = vpop.eup %228 }
  0xa7   :  { %v105_v47 = vmul.f32 %v229_v46, %v91_v28 }
  0xa9   :  { %v231_v48 = vpop.eup %230  ;;  %107 = vst [vmem:[%s337_s6 + $0x8] sm:$0xff] %v105_v47 }
  0xaa   :  { %v160_v49 = vmul.f32 %v231_v48, %v145_v29 }
  0xac   :  { %207 = vst [vmem:[%s337_s6 + $0x18] sm:$0xff] %v160_v49 }

// kernel: encoder_forward.6
= control target key start
LH: loop header
LB: loop body
LE: loop exit
PB: predicated region body
PF: predicated region fallthrough
CT: control target
= control target key end

     0   :  { %v474_v4 = vmov 0   ;;  %vm123_vm0 = vcmask 130048   ;;  %s595_s0 = inlined_call_operand.vmem [shape: bf16[2,144,128], index: 0, kind: input, shape index: {}]   ;;  %s596_s1 = inlined_call_operand.vmem [shape: bf16[24,144], index: 1, kind: input, shape index: {}]   ;;  %s597_s2 = inlined_call_operand.vmem [shape: f32[24,1], index: 2, kind: input, shape index: {}]   ;;  %s598_s3 = inlined_call_operand.vmem [shape: f32[2,24,128], index: 3, kind: output, shape index: {}]  }
   0x1   :  { %v436_v0 = vld [vmem:[%s595_s0 + $0x38] sm:$0xff]  ;;  %v445_v1 = vld [vmem:[%s595_s0 + $0x80] sm:$0xff]  ;;  %v435_v2 = vld [vmem:[%s595_s0 + $0x30] sm:$0xff]  ;;  %448 = vset.pattern.permute.xlu0 %v474_v4  ;;  %449 = vset.pattern.permute.xlu1 %v474_v4 }
   0x2   :  { %130 = vmatpush.bf16.msra.mxu0 %v436_v0  ;;  %260 = vmatpush.bf16.msra.mxu2 %v445_v1  ;;  %v444_v3 = vld [vmem:[%s595_s0 + $0x78] sm:$0xff]  ;;  %v446_v5 = vld [vmem:[%s595_s0 + $0x88] sm:$0xff]  ;;  %v427_v6 = vld [vmem:[%s596_s1 + $0x4] sm:$0xf] }
   0x3   :  { %v326_v7 = vld [vmem:[%s596_s1 + $0x8] sm:$0xf0]  ;;  %v443_v9 = vld [vmem:[%s595_s0 + $0x70] sm:$0xff]  ;;  %v437_v10 = vld [vmem:[%s595_s0 + $0x40] sm:$0xff]  ;;  %285 = vmatpush.bf16.msra.mxu3 %v446_v5 }
   0x4   :  { %v434_v8 = vld [vmem:[%s595_s0 + $0x28] sm:$0xff]  ;;  %v329_v11 = vor.u32 %v427_v6, %v326_v7  ;;  %v18_v12 = vld [vmem:[%s597_s2] sm:$0xff]  ;;  %155 = vmatpush.bf16.msra.mxu1 %v437_v10  ;;  %v432_v15 = vld [vmem:[%s595_s0 + $0x18] sm:$0xff] }
   0x5   :  { %41 = vperm.xlu0 %448, %v18_v12   ;;  %v433_v13 = vld [vmem:[%s595_s0 + $0x20] sm:$0xff]  ;;  %v442_v14 = vld [vmem:[%s595_s0 + $0x68] sm:$0xff]  ;;  %v17_v17 = vld [vmem:[%s596_s1 + $0x10] sm:$0xff] }
   0x6   :  { %131 = vmatpush.bf16.msra.mxu0 %v435_v2  ;;  %261 = vmatpush.bf16.msra.mxu2 %v444_v3  ;;  %v441_v16 = vld [vmem:[%s595_s0 + $0x60] sm:$0xff]  ;;  %v19_v18 = vld [vmem:[%s597_s2 + $0x8] sm:$0xff]  ;;  %v20_v19 = vld [vmem:[%s597_s2 + $0x10] sm:$0xff]  ;;  %v62_v22 = vunpack.c.h.b16 %v17_v17  ;;  %v61_v31 = vunpack.c.l.b16 %v17_v17 }
   0x7   :  { %422 = vmatmul.msk.bf16.vlgmr.msra.gmra.mxu3 %vm123_vm0, %v329_v11  ;;  %366 = vmatmul.msk.bf16.vlgmr.msra.gmra.mxu1 %vm123_vm0, %v329_v11  ;;  %v431_v20 = vld [vmem:[%s595_s0 + $0x10] sm:$0xff]  ;;  %v440_v21 = vld [vmem:[%s595_s0 + $0x58] sm:$0xff]  ;;  %v430_v23 = vld [vmem:[%s595_s0 + $0x8] sm:$0xff] }
   0x8   :  { %51 = vperm.xlu1 %449, %v20_v19   ;;  %v439_v24 = vld [vmem:[%s595_s0 + $0x50] sm:$0xff]  ;;  %v66_v25 = vpack.c.b16 %v62_v22, %v62_v22  ;;  %v429_v26 = vld [vmem:[%s595_s0] sm:$0xff]  ;;  %v438_v27 = vld [vmem:[%s595_s0 + $0x48] sm:$0xff]  ;;  %v65_v32 = vpack.c.b16 %v61_v31, %v61_v31 }
   0x9   :  { %v324_v28 = vld [vmem:[%s596_s1] sm:$0xf]  ;;  %v428_v29 = vld [vmem:[%s596_s1 + $0x4] sm:$0xf0] }
   0xa   :  { %132 = vmatpush.bf16.msra.mxu0 %v434_v8  ;;  %262 = vmatpush.bf16.msra.mxu2 %v443_v9  ;;  %v325_v30 = vor.u32 %v428_v29, %v324_v28 }
   0xd   :  { %46 = vperm.xlu0 %448, %v19_v18  }
   0xe   :  { %133 = vmatpush.bf16.msra.mxu0 %v433_v13  ;;  %263 = vmatpush.bf16.msra.mxu2 %v442_v14 }
  0x12   :  { %134 = vmatpush.bf16.msra.mxu0 %v432_v15  ;;  %264 = vmatpush.bf16.msra.mxu2 %v441_v16 }
  0x16   :  { %135 = vmatpush.bf16.msra.mxu0 %v431_v20  ;;  %265 = vmatpush.bf16.msra.mxu2 %v440_v21 }
  0x17   :  { %423 = vmatmul.msk.bf16.gmra.mxu3 %vm123_vm0, %v66_v25  ;;  %367 = vmatmul.msk.bf16.gmra.mxu1 %vm123_vm0, %v66_v25 }
  0x1a   :  { %136 = vmatpush.bf16.msra.mxu0 %v430_v23  ;;  %266 = vmatpush.bf16.msra.mxu2 %v439_v24 }
  0x1e   :  { %137 = vmatpush.bf16.msra.mxu0 %v429_v26  ;;  %267 = vmatpush.bf16.msra.mxu2 %v438_v27 }
  0x21   :  { %138 = vmatmul.bf16.vlgmr.msra.gmra.mxu0 %v325_v30  ;;  %268 = vmatmul.bf16.vlgmr.msra.gmra.mxu2 %v325_v30 }
  0x31   :  { %143 = vmatmul.bf16.gmra.mxu0 %v65_v32  ;;  %273 = vmatmul.bf16.gmra.mxu2 %v65_v32 }
  0x77   :  { %v42_v38 = vpop.permute.xlu0 %41 }
  0x7a   :  { %v52_v58 = vpop.permute.xlu1 %51 }
  0x7f   :  { %v47_v46 = vpop.permute.xlu0 %46 }
  0x84   :  { %v157_v33 = vpop.f32.mrf.mxu1 }
  0x8a   :  { %v287_v34 = vpop.f32.mrf.mxu3 }
  0x8c   :  { %v159_v35 = vpop.f32.mrf.mxu1 }
  0x92   :  { %v289_v36 = vpop.f32.mrf.mxu3 }
  0x94   :  { %v162_v37 = vpop.f32.mrf.mxu1 }
  0x9a   :  { %v292_v40 = vpop.f32.mrf.mxu3 }
  0x9c   :  { %v164_v42 = vpop.f32.mrf.mxu1 }
  0x9e   :  { %v139_v39 = vpop.f32.mrf.mxu0 }
  0x9f   :  { %v140_v41 = vadd.f32 %v139_v39, %v42_v38 }
  0xa1   :  { %v158_v43 = vadd.f32 %v157_v33, %v140_v41 }
  0xa2   :  { %v294_v50 = vpop.f32.mrf.mxu3 }
  0xa3   :  { %v166_v44 = vsub.f32 0.0, %v158_v43 }
  0xa4   :  { %v269_v45 = vpop.f32.mrf.mxu2 }
  0xa5   :  { %v169_v47 = vmul.f32 1.442695, %v166_v44  ;;  %v270_v48 = vadd.f32 %v269_v45, %v42_v38 }
  0xa6   :  { %v141_v49 = vpop.f32.mrf.mxu0 }
  0xa7   :  { %450 = vpow2.f32 %v169_v47  ;;  %v288_v51 = vadd.f32 %v287_v34, %v270_v48  ;;  %v142_v52 = vadd.f32 %v141_v49, %v47_v46 }
  0xa9   :  { %v296_v53 = vsub.f32 0.0, %v288_v51  ;;  %v160_v54 = vadd.f32 %v159_v35, %v142_v52 }
  0xab   :  { %v299_v55 = vmul.f32 1.442695, %v296_v53  ;;  %v167_v56 = vsub.f32 0.0, %v160_v54 }
  0xac   :  { %v271_v57 = vpop.f32.mrf.mxu2 }
  0xad   :  { %v451_v59 = vpop.eup %450  ;;  %452 = vpow2.f32 %v299_v55  ;;  %v171_v60 = vmul.f32 1.442695, %v167_v56  ;;  %v272_v61 = vadd.f32 %v271_v57, %v47_v46 }
  0xae   :  { %v175_v62 = vadd.f32 1.0, %v451_v59  ;;  %v144_v63 = vpop.f32.mrf.mxu0 }
  0xaf   :  { %454 = vpow2.f32 %v171_v60  ;;  %v290_v0 = vadd.f32 %v289_v36, %v272_v61  ;;  %v145_v1 = vadd.f32 %v144_v63, %v52_v58 }
  0xb0   :  { %456 = vrcp.f32 %v175_v62 }
  0xb1   :  { %v297_v2 = vsub.f32 0.0, %v290_v0  ;;  %v163_v3 = vadd.f32 %v162_v37, %v145_v1 }
  0xb3   :  { %v453_v4 = vpop.eup %452  ;;  %v301_v5 = vmul.f32 1.442695, %v297_v2  ;;  %v168_v6 = vsub.f32 0.0, %v163_v3 }
  0xb4   :  { %v305_v7 = vadd.f32 1.0, %v453_v4  ;;  %v274_v8 = vpop.f32.mrf.mxu2 }
  0xb5   :  { %v455_v9 = vpop.eup %454  ;;  %458 = vpow2.f32 %v301_v5  ;;  %v173_v10 = vmul.f32 1.442695, %v168_v6  ;;  %v275_v11 = vadd.f32 %v274_v8, %v52_v58 }
  0xb6   :  { %v457_v12 = vpop.eup %456  ;;  %460 = vrcp.f32 %v305_v7  ;;  %v176_v13 = vadd.f32 1.0, %v455_v9  ;;  %v146_v14 = vpop.f32.mrf.mxu0 }
  0xb7   :  { %v181_v15 = vmul.f32 %v457_v12, %v158_v43  ;;  %462 = vpow2.f32 %v173_v10  ;;  %v293_v16 = vadd.f32 %v292_v40, %v275_v11 }
  0xb8   :  { %464 = vrcp.f32 %v176_v13 }
  0xb9   :  { %184 = vst [vmem:[%s598_s3] sm:$0xff] %v181_v15  ;;  %v298_v17 = vsub.f32 0.0, %v293_v16 }
  0xbb   :  { %v459_v18 = vpop.eup %458  ;;  %v303_v19 = vmul.f32 1.442695, %v298_v17 }
  0xbc   :  { %v461_v20 = vpop.eup %460  ;;  %v306_v21 = vadd.f32 1.0, %v459_v18  ;;  %v276_v22 = vpop.f32.mrf.mxu2 }
  0xbd   :  { %v463_v23 = vpop.eup %462  ;;  %v311_v24 = vmul.f32 %v461_v20, %v288_v51  ;;  %466 = vpow2.f32 %v303_v19 }
  0xbe   :  { %v465_v25 = vpop.eup %464  ;;  %468 = vrcp.f32 %v306_v21  ;;  %v177_v26 = vadd.f32 1.0, %v463_v23 }
  0xbf   :  { %424 = vst [vmem:[%s598_s3 + $0x18] sm:$0xff] %v311_v24  ;;  %v182_v27 = vmul.f32 %v465_v25, %v160_v54 }
  0xc0   :  { %470 = vrcp.f32 %v177_v26 }
  0xc1   :  { %185 = vst [vmem:[%s598_s3 + $0x8] sm:$0xff] %v182_v27 }
  0xc3   :  { %v467_v28 = vpop.eup %466 }
  0xc4   :  { %v469_v29 = vpop.eup %468  ;;  %v307_v30 = vadd.f32 1.0, %v467_v28 }
  0xc5   :  { %v312_v31 = vmul.f32 %v469_v29, %v290_v0 }
  0xc6   :  { %v471_v32 = vpop.eup %470  ;;  %472 = vrcp.f32 %v307_v30 }
  0xc7   :  { %425 = vst [vmem:[%s598_s3 + $0x20] sm:$0xff] %v312_v31  ;;  %v183_v33 = vmul.f32 %v471_v32, %v163_v3 }
  0xc9   :  { %186 = vst [vmem:[%s598_s3 + $0x10] sm:$0xff] %v183_v33 }
  0xcc   :  { %v473_v34 = vpop.eup %472 }
  0xcd   :  { %v313_v35 = vmul.f32 %v473_v34, %v293_v16 }
  0xcf   :  { %426 = vst [vmem:[%s598_s3 + $0x28] sm:$0xff] %v313_v35 }

// kernel: encoder_forward.7
= control target key start
LH: loop header
LB: loop body
LE: loop exit
PB: predicated region body
PF: predicated region fallthrough
CT: control target
= control target key end

     0   :  { %v661_v7 = vmov 0   ;;  %vm173_vm0 = vcmask 785408   ;;  %s830_s0 = inlined_call_operand.vmem [shape: bf16[2,224,128], index: 0, kind: input, shape index: {}]   ;;  %s831_s2 = inlined_call_operand.vmem [shape: f32[32,1], index: 2, kind: input, shape index: {}]   ;;  %s832_s1 = inlined_call_operand.vmem [shape: bf16[32,224], index: 1, kind: input, shape index: {}]   ;;  %s833_s3 = inlined_call_operand.vmem [shape: f32[2,32,128], index: 3, kind: output, shape index: {}]  }
   0x1   :  { %v605_v0 = vld [vmem:[%s830_s0 + $0x38] sm:$0xff]  ;;  %v619_v1 = vld [vmem:[%s830_s0 + $0xa8] sm:$0xff]  ;;  %v604_v3 = vld [vmem:[%s830_s0 + $0x30] sm:$0xff]  ;;  %627 = vset.pattern.permute.xlu0 %v661_v7  ;;  %628 = vset.pattern.permute.xlu1 %v661_v7 }
   0x2   :  { %v625_v2 = vld [vmem:[%s830_s0 + $0xd8] sm:$0xff]  ;;  %180 = vmatpush.bf16.msra.mxu0 %v605_v0  ;;  %359 = vmatpush.bf16.msra.mxu2 %v619_v1  ;;  %v618_v4 = vld [vmem:[%s830_s0 + $0xa0] sm:$0xff]  ;;  %v611_v5 = vld [vmem:[%s830_s0 + $0x68] sm:$0xff] }
   0x3   :  { %380 = vmatpush.bf16.msra.mxu3 %v625_v2  ;;  %v624_v6 = vld [vmem:[%s830_s0 + $0xd0] sm:$0xff]  ;;  %201 = vmatpush.bf16.msra.mxu1 %v611_v5  ;;  %v610_v8 = vld [vmem:[%s830_s0 + $0x60] sm:$0xff]  ;;  %v603_v9 = vld [vmem:[%s830_s0 + $0x28] sm:$0xff] }
   0x4   :  { %v617_v10 = vld [vmem:[%s830_s0 + $0x98] sm:$0xff]  ;;  %v623_v11 = vld [vmem:[%s830_s0 + $0xc8] sm:$0xff]  ;;  %v602_v13 = vld [vmem:[%s830_s0 + $0x20] sm:$0xff] }
   0x5   :  { %v609_v12 = vld [vmem:[%s830_s0 + $0x58] sm:$0xff]  ;;  %v616_v14 = vld [vmem:[%s830_s0 + $0x90] sm:$0xff]  ;;  %v622_v15 = vld [vmem:[%s830_s0 + $0xc0] sm:$0xff] }
   0x6   :  { %181 = vmatpush.bf16.msra.mxu0 %v604_v3  ;;  %360 = vmatpush.bf16.msra.mxu2 %v618_v4  ;;  %v19_v16 = vld [vmem:[%s831_s2] sm:$0xff]  ;;  %v608_v17 = vld [vmem:[%s830_s0 + $0x50] sm:$0xff]  ;;  %v601_v18 = vld [vmem:[%s830_s0 + $0x18] sm:$0xff] }
   0x7   :  { %381 = vmatpush.bf16.msra.mxu3 %v624_v6  ;;  %202 = vmatpush.bf16.msra.mxu1 %v610_v8  ;;  %v615_v19 = vld [vmem:[%s830_s0 + $0x88] sm:$0xff]  ;;  %v621_v20 = vld [vmem:[%s830_s0 + $0xb8] sm:$0xff]  ;;  %v21_v23 = vld [vmem:[%s831_s2 + $0x10] sm:$0xff] }
   0x8   :  { %53 = vperm.xlu0 %627, %v19_v16   ;;  %v607_v21 = vld [vmem:[%s830_s0 + $0x48] sm:$0xff]  ;;  %v600_v24 = vld [vmem:[%s830_s0 + $0x10] sm:$0xff]  ;;  %v614_v25 = vld [vmem:[%s830_s0 + $0x80] sm:$0xff]  ;;  %63 = vperm.xlu1 %628, %v21_v23  }
   0x9   :  { %v20_v22 = vld [vmem:[%s831_s2 + $0x8] sm:$0xff]  ;;  %v620_v26 = vld [vmem:[%s830_s0 + $0xb0] sm:$0xff]  ;;  %v594_v27 = vld [vmem:[%s832_s1 + $0x4] sm:$0xf] }
   0xa   :  { %182 = vmatpush.bf16.msra.mxu0 %v603_v9  ;;  %361 = vmatpush.bf16.msra.mxu2 %v617_v10  ;;  %v434_v28 = vld [vmem:[%s832_s1 + $0x8] sm:$0xf0]  ;;  %v606_v29 = vld [vmem:[%s830_s0 + $0x40] sm:$0xff]  ;;  %v613_v31 = vld [vmem:[%s830_s0 + $0x78] sm:$0xff] }
   0xb   :  { %382 = vmatpush.bf16.msra.mxu3 %v623_v11  ;;  %203 = vmatpush.bf16.msra.mxu1 %v609_v12  ;;  %v599_v30 = vld [vmem:[%s830_s0 + $0x8] sm:$0xff]  ;;  %v437_v32 = vor.u32 %v594_v27, %v434_v28  ;;  %v598_v33 = vld [vmem:[%s830_s0] sm:$0xff]  ;;  %v22_v34 = vld [vmem:[%s831_s2 + $0x18] sm:$0xff] }
   0xc   :  { %v612_v35 = vld [vmem:[%s830_s0 + $0x70] sm:$0xff]  ;;  %v432_v36 = vld [vmem:[%s832_s1] sm:$0xf]  ;;  %v595_v37 = vld [vmem:[%s832_s1 + $0x4] sm:$0xf0] }
   0xd   :  { %v433_v38 = vor.u32 %v595_v37, %v432_v36  ;;  %v596_v39 = vld [vmem:[%s832_s1 + $0x14] sm:$0xf]  ;;  %v442_v40 = vld [vmem:[%s832_s1 + $0x18] sm:$0xf0]  ;;  %v440_v42 = vld [vmem:[%s832_s1 + $0x10] sm:$0xf] }
   0xe   :  { %183 = vmatpush.bf16.msra.mxu0 %v602_v13  ;;  %362 = vmatpush.bf16.msra.mxu2 %v616_v14  ;;  %v445_v41 = vor.u32 %v596_v39, %v442_v40  ;;  %v597_v43 = vld [vmem:[%s832_s1 + $0x14] sm:$0xf0] }
   0xf   :  { %383 = vmatpush.bf16.msra.mxu3 %v622_v15  ;;  %204 = vmatpush.bf16.msra.mxu1 %v608_v17  ;;  %v441_v44 = vor.u32 %v597_v43, %v440_v42 }
  0x10   :  { %58 = vperm.xlu0 %627, %v20_v22   ;;  %68 = vperm.xlu1 %628, %v22_v34  }
  0x12   :  { %184 = vmatpush.bf16.msra.mxu0 %v601_v18  ;;  %363 = vmatpush.bf16.msra.mxu2 %v615_v19 }
  0x13   :  { %384 = vmatpush.bf16.msra.mxu3 %v621_v20  ;;  %205 = vmatpush.bf16.msra.mxu1 %v607_v21 }
  0x16   :  { %185 = vmatpush.bf16.msra.mxu0 %v600_v24  ;;  %364 = vmatpush.bf16.msra.mxu2 %v614_v25 }
  0x17   :  { %385 = vmatpush.bf16.msra.mxu3 %v620_v26  ;;  %206 = vmatpush.bf16.msra.mxu1 %v606_v29 }
  0x1a   :  { %186 = vmatpush.bf16.msra.mxu0 %v599_v30  ;;  %365 = vmatpush.bf16.msra.mxu2 %v613_v31 }
  0x1b   :  { %588 = vmatmul.msk.bf16.vlgmr.msra.gmra.mxu3 %vm173_vm0, %v437_v32  ;;  %502 = vmatmul.msk.bf16.vlgmr.msra.gmra.mxu1 %vm173_vm0, %v437_v32 }
  0x1e   :  { %187 = vmatpush.bf16.msra.mxu0 %v598_v33  ;;  %366 = vmatpush.bf16.msra.mxu2 %v612_v35 }
  0x21   :  { %188 = vmatmul.bf16.vlgmr.msra.gmra.mxu0 %v433_v38  ;;  %367 = vmatmul.bf16.vlgmr.msra.gmra.mxu2 %v433_v38 }
  0x2b   :  { %589 = vmatmul.msk.bf16.gmra.mxu3 %vm173_vm0, %v445_v41  ;;  %503 = vmatmul.msk.bf16.gmra.mxu1 %vm173_vm0, %v445_v41 }
  0x31   :  { %193 = vmatmul.bf16.gmra.mxu0 %v441_v44  ;;  %372 = vmatmul.bf16.gmra.mxu2 %v441_v44 }
  0x7a   :  { %v54_v45 = vpop.permute.xlu0 %53  ;;  %v64_v1 = vpop.permute.xlu1 %63 }
  0x82   :  { %v59_v52 = vpop.permute.xlu0 %58  ;;  %v69_v24 = vpop.permute.xlu1 %68 }
  0x98   :  { %v208_v46 = vpop.f32.mrf.mxu1 }
  0x9e   :  { %v189_v47 = vpop.f32.mrf.mxu0  ;;  %v387_v49 = vpop.f32.mrf.mxu3 }
  0x9f   :  { %v190_v48 = vadd.f32 %v189_v47, %v54_v45 }
  0xa0   :  { %v210_v54 = vpop.f32.mrf.mxu1 }
  0xa1   :  { %v209_v50 = vadd.f32 %v208_v46, %v190_v48 }
  0xa3   :  { %v218_v51 = vsub.f32 0.0, %v209_v50 }
  0xa4   :  { %v368_v53 = vpop.f32.mrf.mxu2 }
  0xa5   :  { %v222_v55 = vmul.f32 1.442695, %v218_v51  ;;  %v369_v56 = vadd.f32 %v368_v53, %v54_v45 }
  0xa6   :  { %v191_v57 = vpop.f32.mrf.mxu0  ;;  %v389_v62 = vpop.f32.mrf.mxu3 }
  0xa7   :  { %629 = vpow2.f32 %v222_v55  ;;  %v388_v58 = vadd.f32 %v387_v49, %v369_v56  ;;  %v192_v59 = vadd.f32 %v191_v57, %v59_v52 }
  0xa8   :  { %v213_v8 = vpop.f32.mrf.mxu1 }
  0xa9   :  { %v397_v60 = vsub.f32 0.0, %v388_v58  ;;  %v211_v61 = vadd.f32 %v210_v54, %v192_v59 }
  0xab   :  { %v401_v63 = vmul.f32 1.442695, %v397_v60  ;;  %v219_v0 = vsub.f32 0.0, %v211_v61 }
  0xac   :  { %v370_v2 = vpop.f32.mrf.mxu2 }
  0xad   :  { %v630_v3 = vpop.eup %629  ;;  %631 = vpow2.f32 %v401_v63  ;;  %v224_v4 = vmul.f32 1.442695, %v219_v0  ;;  %v371_v5 = vadd.f32 %v370_v2, %v59_v52 }
  0xae   :  { %v230_v6 = vadd.f32 1.0, %v630_v3  ;;  %v194_v7 = vpop.f32.mrf.mxu0  ;;  %v392_v17 = vpop.f32.mrf.mxu3 }
  0xaf   :  { %633 = vpow2.f32 %v224_v4  ;;  %v390_v9 = vadd.f32 %v389_v62, %v371_v5  ;;  %v195_v10 = vadd.f32 %v194_v7, %v64_v1 }
  0xb0   :  { %635 = vrcp.f32 %v230_v6  ;;  %v215_v29 = vpop.f32.mrf.mxu1 }
  0xb1   :  { %v398_v11 = vsub.f32 0.0, %v390_v9  ;;  %v214_v12 = vadd.f32 %v213_v8, %v195_v10 }
  0xb3   :  { %v632_v13 = vpop.eup %631  ;;  %v403_v14 = vmul.f32 1.442695, %v398_v11  ;;  %v220_v15 = vsub.f32 0.0, %v214_v12 }
  0xb4   :  { %v409_v16 = vadd.f32 1.0, %v632_v13  ;;  %v373_v18 = vpop.f32.mrf.mxu2 }
  0xb5   :  { %v634_v19 = vpop.eup %633  ;;  %637 = vpow2.f32 %v403_v14  ;;  %v226_v20 = vmul.f32 1.442695, %v220_v15  ;;  %v374_v21 = vadd.f32 %v373_v18, %v64_v1 }
  0xb6   :  { %v636_v22 = vpop.eup %635  ;;  %639 = vrcp.f32 %v409_v16  ;;  %v231_v23 = vadd.f32 1.0, %v634_v19  ;;  %v196_v25 = vpop.f32.mrf.mxu0 }
  0xb7   :  { %v238_v26 = vmul.f32 %v636_v22, %v209_v50  ;;  %641 = vpow2.f32 %v226_v20  ;;  %v393_v27 = vadd.f32 %v392_v17, %v374_v21  ;;  %v197_v28 = vadd.f32 %v196_v25, %v69_v24  ;;  %v394_v44 = vpop.f32.mrf.mxu3 }
  0xb8   :  { %643 = vrcp.f32 %v231_v23 }
  0xb9   :  { %242 = vst [vmem:[%s833_s3] sm:$0xff] %v238_v26  ;;  %v399_v30 = vsub.f32 0.0, %v393_v27  ;;  %v216_v31 = vadd.f32 %v215_v29, %v197_v28 }
  0xbb   :  { %v638_v32 = vpop.eup %637  ;;  %v405_v33 = vmul.f32 1.442695, %v399_v30  ;;  %v221_v34 = vsub.f32 0.0, %v216_v31 }
  0xbc   :  { %v640_v35 = vpop.eup %639  ;;  %v410_v36 = vadd.f32 1.0, %v638_v32  ;;  %v375_v37 = vpop.f32.mrf.mxu2 }
  0xbd   :  { %v642_v38 = vpop.eup %641  ;;  %v417_v39 = vmul.f32 %v640_v35, %v388_v58  ;;  %645 = vpow2.f32 %v405_v33  ;;  %v228_v40 = vmul.f32 1.442695, %v221_v34  ;;  %v376_v41 = vadd.f32 %v375_v37, %v69_v24 }
  0xbe   :  { %v644_v42 = vpop.eup %643  ;;  %647 = vrcp.f32 %v410_v36  ;;  %v232_v43 = vadd.f32 1.0, %v642_v38 }
  0xbf   :  { %590 = vst [vmem:[%s833_s3 + $0x20] sm:$0xff] %v417_v39  ;;  %v239_v45 = vmul.f32 %v644_v42, %v211_v61  ;;  %649 = vpow2.f32 %v228_v40  ;;  %v395_v46 = vadd.f32 %v394_v44, %v376_v41 }
  0xc0   :  { %651 = vrcp.f32 %v232_v43 }
  0xc1   :  { %243 = vst [vmem:[%s833_s3 + $0x8] sm:$0xff] %v239_v45  ;;  %v400_v47 = vsub.f32 0.0, %v395_v46 }
  0xc3   :  { %v646_v48 = vpop.eup %645  ;;  %v407_v49 = vmul.f32 1.442695, %v400_v47 }
  0xc4   :  { %v648_v50 = vpop.eup %647  ;;  %v411_v51 = vadd.f32 1.0, %v646_v48 }
  0xc5   :  { %v650_v52 = vpop.eup %649  ;;  %v418_v53 = vmul.f32 %v648_v50, %v390_v9  ;;  %653 = vpow2.f32 %v407_v49 }
  0xc6   :  { %v652_v54 = vpop.eup %651  ;;  %655 = vrcp.f32 %v411_v51  ;;  %v233_v55 = vadd.f32 1.0, %v650_v52 }
  0xc7   :  { %591 = vst [vmem:[%s833_s3 + $0x28] sm:$0xff] %v418_v53  ;;  %v240_v56 = vmul.f32 %v652_v54, %v214_v12 }
  0xc8   :  { %657 = vrcp.f32 %v233_v55 }
  0xc9   :  { %244 = vst [vmem:[%s833_s3 + $0x10] sm:$0xff] %v240_v56 }
  0xcb   :  { %v654_v57 = vpop.eup %653 }
  0xcc   :  { %v656_v58 = vpop.eup %655  ;;  %v412_v59 = vadd.f32 1.0, %v654_v57 }
  0xcd   :  { %v419_v60 = vmul.f32 %v656_v58, %v393_v27 }
  0xce   :  { %v658_v61 = vpop.eup %657  ;;  %659 = vrcp.f32 %v412_v59 }
  0xcf   :  { %592 = vst [vmem:[%s833_s3 + $0x30] sm:$0xff] %v419_v60  ;;  %v241_v62 = vmul.f32 %v658_v61, %v216_v31 }
  0xd1   :  { %245 = vst [vmem:[%s833_s3 + $0x18] sm:$0xff] %v241_v62 }
  0xd4   :  { %v660_v63 = vpop.eup %659 }
  0xd5   :  { %v420_v0 = vmul.f32 %v660_v63, %v395_v46 }
  0xd7   :  { %593 = vst [vmem:[%s833_s3 + $0x38] sm:$0xff] %v420_v0 }

// kernel: encoder_forward.8
= control target key start
LH: loop header
LB: loop body
LE: loop exit
PB: predicated region body
PF: predicated region fallthrough
CT: control target
= control target key end

     0   :  { %vm252_vm0 = vcmask 261120   ;;  %v973_v14 = vmov 0   ;;  %s1273_s0 = inlined_call_operand.vmem [shape: bf16[2,288,128], index: 0, kind: input, shape index: {}]   ;;  %s1274_s1 = inlined_call_operand.vmem [shape: bf16[48,288], index: 1, kind: input, shape index: {}]   ;;  %s1275_s2 = inlined_call_operand.vmem [shape: f32[48,1], index: 2, kind: input, shape index: {}]   ;;  %s1276_s3 = inlined_call_operand.vmem [shape: f32[2,48,128], index: 3, kind: output, shape index: {}]  }
   0x1   :  { %v884_v0 = vld [vmem:[%s1273_s0 + $0x38] sm:$0xff]  ;;  %v894_v1 = vld [vmem:[%s1273_s0 + $0x88] sm:$0xff]  ;;  %v883_v2 = vld [vmem:[%s1273_s0 + $0x30] sm:$0xff]  ;;  %923 = vset.pattern.permute.xlu1 %v973_v14  ;;  %922 = vset.pattern.permute.xlu0 %v973_v14 }
   0x2   :  { %913 = vmatpush.bf16.msra.mxu1 %v884_v0  ;;  %316 = vmatpush.bf16.msra.mxu2 %v894_v1  ;;  %v893_v3 = vld [vmem:[%s1273_s0 + $0x80] sm:$0xff]  ;;  %v650_v4 = vld [vmem:[%s1274_s1 + $0x8] sm:$0xf]  ;;  %v870_v5 = vld [vmem:[%s1274_s1 + $0x10] sm:$0xf0] }
   0x3   :  { %v910_v6 = vld [vmem:[%s1273_s0 + $0x108] sm:$0xff]  ;;  %262 = vmatpush.bf16.msra.mxu0 %v884_v0  ;;  %v1018_v8 = vor.u32 %v870_v5, %v650_v4  ;;  %v901_v9 = vld [vmem:[%s1273_s0 + $0xc0] sm:$0xff]  ;;  %v900_v12 = vld [vmem:[%s1273_s0 + $0xb8] sm:$0xff]  ;;  %924 = vset.pattern.permute.xlu2 %v973_v14 }
   0x4   :  { %v902_v7 = vld [vmem:[%s1273_s0 + $0xc8] sm:$0xff]  ;;  %v909_v11 = vld [vmem:[%s1273_s0 + $0x100] sm:$0xff]  ;;  %v908_v15 = vld [vmem:[%s1273_s0 + $0xf8] sm:$0xff] }
   0x5   :  { %521 = vmatpush.bf16.msra.mxu3 %v902_v7  ;;  %v882_v10 = vld [vmem:[%s1273_s0 + $0x28] sm:$0xff]  ;;  %v881_v13 = vld [vmem:[%s1273_s0 + $0x20] sm:$0xff]  ;;  %v29_v16 = vld [vmem:[%s1275_s2 + $0x10] sm:$0xff] }
   0x6   :  { %914 = vmatpush.bf16.msra.mxu1 %v883_v2  ;;  %317 = vmatpush.bf16.msra.mxu2 %v893_v3  ;;  %v899_v17 = vld [vmem:[%s1273_s0 + $0xb0] sm:$0xff]  ;;  %v880_v18 = vld [vmem:[%s1273_s0 + $0x18] sm:$0xff]  ;;  %v898_v21 = vld [vmem:[%s1273_s0 + $0xa8] sm:$0xff] }
   0x7   :  { %263 = vmatpush.bf16.msra.mxu0 %v883_v2  ;;  %81 = vperm.xlu1 %923, %v29_v16   ;;  %v907_v19 = vld [vmem:[%s1273_s0 + $0xf0] sm:$0xff]  ;;  %v662_v22 = vld [vmem:[%s1274_s1 + $0x20] sm:$0xf]  ;;  %v873_v23 = vld [vmem:[%s1274_s1 + $0x28] sm:$0xf0] }
   0x8   :  { %v879_v20 = vld [vmem:[%s1273_s0 + $0x10] sm:$0xff]  ;;  %v30_v24 = vld [vmem:[%s1275_s2 + $0x18] sm:$0xff]  ;;  %v906_v25 = vld [vmem:[%s1273_s0 + $0xe8] sm:$0xff]  ;;  %v1073_v27 = vor.u32 %v873_v23, %v662_v22 }
   0x9   :  { %748 = vmatmul.msk.bf16.vlgmr.msra.gmra.mxu2 %vm252_vm0, %v1018_v8  ;;  %522 = vmatpush.bf16.msra.mxu3 %v901_v9  ;;  %v27_v26 = vld [vmem:[%s1275_s2] sm:$0xff]  ;;  %v878_v29 = vld [vmem:[%s1273_s0 + $0x8] sm:$0xff]  ;;  %v896_v32 = vld [vmem:[%s1273_s0 + $0x98] sm:$0xff] }
   0xa   :  { %545 = vmatpush.bf16.msrb.mxu2 %v910_v6  ;;  %915 = vmatpush.bf16.msra.mxu1 %v882_v10  ;;  %v897_v28 = vld [vmem:[%s1273_s0 + $0xa0] sm:$0xff]  ;;  %v654_v33 = vld [vmem:[%s1274_s1 + $0x18] sm:$0xf]  ;;  %v869_v37 = vld [vmem:[%s1274_s1 + $0x8] sm:$0xf0] }
   0xb   :  { %264 = vmatpush.bf16.msra.mxu0 %v882_v10  ;;  %71 = vperm.xlu0 %922, %v27_v26   ;;  %v905_v30 = vld [vmem:[%s1273_s0 + $0xe0] sm:$0xff]  ;;  %v892_v35 = vld [vmem:[%s1273_s0 + $0x78] sm:$0xff]  ;;  %v28_v38 = vld [vmem:[%s1275_s2 + $0x8] sm:$0xff] }
   0xc   :  { %v877_v31 = vld [vmem:[%s1273_s0] sm:$0xff]  ;;  %v904_v39 = vld [vmem:[%s1273_s0 + $0xd8] sm:$0xff]  ;;  %v895_v42 = vld [vmem:[%s1273_s0 + $0x90] sm:$0xff] }
   0xd   :  { %523 = vmatpush.bf16.msra.mxu3 %v900_v12  ;;  %v872_v34 = vld [vmem:[%s1274_s1 + $0x20] sm:$0xf0]  ;;  %v642_v36 = vld [vmem:[%s1274_s1] sm:$0xf]  ;;  %v912_v40 = vld [vmem:[%s1273_s0 + $0x118] sm:$0xff] }
   0xe   :  { %546 = vmatpush.bf16.msrb.mxu2 %v909_v11  ;;  %916 = vmatpush.bf16.msra.mxu1 %v881_v13  ;;  %v655_v41 = vor.u32 %v872_v34, %v654_v33  ;;  %v643_v43 = vor.u32 %v869_v37, %v642_v36  ;;  %v891_v44 = vld [vmem:[%s1273_s0 + $0x70] sm:$0xff]  ;;  %v674_v47 = vld [vmem:[%s1274_s1 + $0x38] sm:$0xf]  ;;  %v876_v48 = vld [vmem:[%s1274_s1 + $0x40] sm:$0xf0] }
   0xf   :  { %265 = vmatpush.bf16.msra.mxu0 %v881_v13  ;;  %86 = vperm.xlu1 %923, %v30_v24   ;;  %v903_v45 = vld [vmem:[%s1273_s0 + $0xd0] sm:$0xff]  ;;  %v890_v49 = vld [vmem:[%s1273_s0 + $0x68] sm:$0xff]  ;;  %v675_v50 = vor.u32 %v876_v48, %v674_v47  ;;  %v889_v51 = vld [vmem:[%s1273_s0 + $0x60] sm:$0xff] }
  0x10   :  { %v911_v46 = vld [vmem:[%s1273_s0 + $0x110] sm:$0xff]  ;;  %v875_v53 = vld [vmem:[%s1274_s1 + $0x38] sm:$0xf0]  ;;  %v31_v57 = vld [vmem:[%s1275_s2 + $0x20] sm:$0xff] }
  0x11   :  { %524 = vmatpush.bf16.msra.mxu3 %v899_v17  ;;  %v666_v52 = vld [vmem:[%s1274_s1 + $0x30] sm:$0xf]  ;;  %v888_v54 = vld [vmem:[%s1273_s0 + $0x58] sm:$0xff]  ;;  %v868_v58 = vld [vmem:[%s1274_s1 + $0x4] sm:$0xf]  ;;  %91 = vperm.xlu2 %924, %v31_v57  }
  0x12   :  { %547 = vmatpush.bf16.msrb.mxu2 %v908_v15  ;;  %917 = vmatpush.bf16.msra.mxu1 %v880_v18  ;;  %v667_v55 = vor.u32 %v875_v53, %v666_v52  ;;  %v887_v56 = vld [vmem:[%s1273_s0 + $0x50] sm:$0xff]  ;;  %v886_v60 = vld [vmem:[%s1273_s0 + $0x48] sm:$0xff]  ;;  %v885_v62 = vld [vmem:[%s1273_s0 + $0x40] sm:$0xff] }
  0x13   :  { %266 = vmatpush.bf16.msra.mxu0 %v880_v18  ;;  %76 = vperm.xlu0 %922, %v28_v38   ;;  %v644_v59 = vld [vmem:[%s1274_s1 + $0xc] sm:$0xf0]  ;;  %v32_v63 = vld [vmem:[%s1275_s2 + $0x28] sm:$0xff]  ;;  %v871_v0 = vld [vmem:[%s1274_s1 + $0x1c] sm:$0xf] }
  0x14   :  { %v647_v61 = vor.u32 %v868_v58, %v644_v59  ;;  %v656_v1 = vld [vmem:[%s1274_s1 + $0x24] sm:$0xf0]  ;;  %v874_v3 = vld [vmem:[%s1274_s1 + $0x34] sm:$0xf]  ;;  %v668_v4 = vld [vmem:[%s1274_s1 + $0x3c] sm:$0xf0] }
  0x15   :  { %525 = vmatpush.bf16.msra.mxu3 %v898_v21  ;;  %v659_v2 = vor.u32 %v871_v0, %v656_v1  ;;  %v671_v5 = vor.u32 %v874_v3, %v668_v4 }
  0x16   :  { %548 = vmatpush.bf16.msrb.mxu2 %v907_v19  ;;  %918 = vmatpush.bf16.msra.mxu1 %v879_v20 }
  0x17   :  { %267 = vmatpush.bf16.msra.mxu0 %v879_v20 }
  0x19   :  { %749 = vmatmul.msk.bf16.gmra.mxu2 %vm252_vm0, %v1073_v27  ;;  %526 = vmatpush.bf16.msra.mxu3 %v897_v28 }
  0x1a   :  { %549 = vmatpush.bf16.msrb.mxu2 %v906_v25  ;;  %919 = vmatpush.bf16.msra.mxu1 %v878_v29 }
  0x1b   :  { %268 = vmatpush.bf16.msra.mxu0 %v878_v29  ;;  %96 = vperm.xlu2 %924, %v32_v63  }
  0x1d   :  { %527 = vmatpush.bf16.msra.mxu3 %v896_v32 }
  0x1e   :  { %550 = vmatpush.bf16.msrb.mxu2 %v905_v30  ;;  %920 = vmatpush.bf16.msra.mxu1 %v877_v31 }
  0x1f   :  { %269 = vmatpush.bf16.msra.mxu0 %v877_v31 }
  0x21   :  { %275 = vmatmul.bf16.vlgmr.msra.gmra.mxu1 %v655_v41  ;;  %528 = vmatpush.bf16.msra.mxu3 %v895_v42 }
  0x22   :  { %286 = vmatpush.bf16.msrb.mxu1 %v892_v35  ;;  %551 = vmatpush.bf16.msrb.mxu2 %v904_v39 }
  0x23   :  { %575 = vmatpush.bf16.msrb.mxu0 %v912_v40 }
  0x24   :  { %270 = vmatmul.bf16.vlgmr.msra.gmra.mxu0 %v643_v43  ;;  %529 = vmatmul.bf16.vlgmr.msra.gmra.mxu3 %v643_v43 }
  0x26   :  { %287 = vmatpush.bf16.msrb.mxu1 %v891_v44  ;;  %552 = vmatpush.bf16.msrb.mxu2 %v903_v45 }
  0x27   :  { %576 = vmatpush.bf16.msrb.mxu0 %v911_v46 }
  0x29   :  { %750 = vmatmul.msk.bf16.gmra.mxu2 %vm252_vm0, %v675_v50 }
  0x2a   :  { %288 = vmatpush.bf16.msrb.mxu1 %v890_v49 }
  0x2e   :  { %289 = vmatpush.bf16.msrb.mxu1 %v889_v51 }
  0x31   :  { %280 = vmatmul.bf16.gmra.mxu1 %v667_v55 }
  0x32   :  { %290 = vmatpush.bf16.msrb.mxu1 %v888_v54 }
  0x34   :  { %859 = vmatmul.msk.bf16.vlgmr.msrb.gmra.mxu0 %vm252_vm0, %v1018_v8  ;;  %534 = vmatmul.bf16.gmra.mxu3 %v655_v41 }
  0x36   :  { %291 = vmatpush.bf16.msrb.mxu1 %v887_v56 }
  0x39   :  { %553 = vmatmul.bf16.vlgmr.msrb.gmra.mxu2 %v647_v61 }
  0x3a   :  { %292 = vmatpush.bf16.msrb.mxu1 %v886_v60 }
  0x3e   :  { %293 = vmatpush.bf16.msrb.mxu1 %v885_v62 }
  0x41   :  { %294 = vmatmul.bf16.vlgmr.msrb.gmra.mxu1 %v647_v61 }
  0x44   :  { %860 = vmatmul.msk.bf16.gmra.mxu0 %vm252_vm0, %v1073_v27  ;;  %539 = vmatmul.bf16.gmra.mxu3 %v667_v55 }
  0x49   :  { %558 = vmatmul.bf16.gmra.mxu2 %v659_v2 }
  0x51   :  { %299 = vmatmul.bf16.gmra.mxu1 %v659_v2 }
  0x54   :  { %861 = vmatmul.msk.bf16.gmra.mxu0 %vm252_vm0, %v675_v50 }
  0x59   :  { %563 = vmatmul.bf16.gmra.mxu2 %v671_v5 }
  0x61   :  { %304 = vmatmul.bf16.gmra.mxu1 %v671_v5 }
  0x79   :  { %v82_v42 = vpop.permute.xlu1 %81 }
  0x7d   :  { %v72_v20 = vpop.permute.xlu0 %71 }
  0x81   :  { %v87_v63 = vpop.permute.xlu1 %86 }
  0x85   :  { %v77_v32 = vpop.permute.xlu0 %76 }
  0x8c   :  { %v319_v6 = vpop.f32.mrf.mxu2 }
  0x94   :  { %v321_v7 = vpop.f32.mrf.mxu2 }
  0x9c   :  { %v1188_v8 = vpop.f32.mrf.mxu2 }
  0x9e   :  { %v276_v9 = vpop.f32.mrf.mxu1 }
  0x9f   :  { %v277_v56 = vadd.f32 %v276_v9, %v82_v42 }
  0xa1   :  { %v271_v10 = vpop.f32.mrf.mxu0 }
  0xa2   :  { %v272_v24 = vadd.f32 %v271_v10, %v72_v20 }
  0xa4   :  { %v1190_v11 = vpop.f32.mrf.mxu2 }
  0xa6   :  { %v1192_v12 = vpop.f32.mrf.mxu1 }
  0xa7   :  { %v530_v16 = vpop.f32.mrf.mxu3  ;;  %v279_v9 = vadd.f32 %v1192_v12, %v87_v63 }
  0xa8   :  { %v531_v22 = vadd.f32 %v530_v16, %v72_v20 }
  0xa9   :  { %v273_v13 = vpop.f32.mrf.mxu0 }
  0xaa   :  { %v274_v38 = vadd.f32 %v273_v13, %v77_v32 }
  0xac   :  { %v1194_v14 = vpop.f32.mrf.mxu2 }
  0xae   :  { %v1196_v15 = vpop.f32.mrf.mxu1 }
  0xaf   :  { %v532_v21 = vpop.f32.mrf.mxu3 }
  0xb0   :  { %v533_v34 = vadd.f32 %v532_v21, %v77_v32 }
  0xb1   :  { %v578_v18 = vpop.f32.mrf.mxu0 }
  0xb4   :  { %v1198_v17 = vpop.f32.mrf.mxu2 }
  0xb6   :  { %v1200_v19 = vpop.f32.mrf.mxu1 }
  0xb7   :  { %v535_v33 = vpop.f32.mrf.mxu3 }
  0xb8   :  { %v536_v46 = vadd.f32 %v535_v33, %v82_v42 }
  0xb9   :  { %v580_v27 = vpop.f32.mrf.mxu0 }
  0xbc   :  { %v554_v23 = vpop.f32.mrf.mxu2 }
  0xbd   :  { %v555_v25 = vadd.f32 %v554_v23, %v531_v22 }
  0xbe   :  { %v295_v26 = vpop.f32.mrf.mxu1 }
  0xbf   :  { %v579_v28 = vadd.f32 %v578_v18, %v555_v25  ;;  %v296_v29 = vadd.f32 %v295_v26, %v272_v24  ;;  %v537_v53 = vpop.f32.mrf.mxu3  ;;  %v92_v25 = vpop.permute.xlu2 %91 }
  0xc0   :  { %v538_v4 = vadd.f32 %v537_v53, %v87_v63 }
  0xc1   :  { %v593_v30 = vsub.f32 0.0, %v579_v28  ;;  %v1202_v31 = vadd.f32 %v319_v6, %v296_v29  ;;  %v583_v45 = vpop.f32.mrf.mxu0 }
  0xc3   :  { %v599_v35 = vmul.f32 1.442695, %v593_v30  ;;  %v334_v36 = vsub.f32 0.0, %v1202_v31 }
  0xc4   :  { %v556_v37 = vpop.f32.mrf.mxu2 }
  0xc5   :  { %925 = vpow2.f32 %v599_v35  ;;  %v340_v39 = vmul.f32 1.442695, %v334_v36  ;;  %v557_v40 = vadd.f32 %v556_v37, %v533_v34  ;;  %v282_v35 = vadd.f32 %v1196_v15, %v92_v25 }
  0xc6   :  { %v297_v41 = vpop.f32.mrf.mxu1 }
  0xc7   :  { %927 = vpow2.f32 %v340_v39  ;;  %v1205_v43 = vadd.f32 %v580_v27, %v557_v40  ;;  %v298_v44 = vadd.f32 %v297_v41, %v274_v38  ;;  %v540_v23 = vpop.f32.mrf.mxu3 }
  0xc9   :  { %v594_v47 = vsub.f32 0.0, %v1205_v43  ;;  %v1208_v48 = vadd.f32 %v321_v7, %v298_v44  ;;  %v585_v2 = vpop.f32.mrf.mxu0 }
  0xcb   :  { %v926_v49 = vpop.eup %925  ;;  %v601_v50 = vmul.f32 1.442695, %v594_v47  ;;  %v335_v51 = vsub.f32 0.0, %v1208_v48 }
  0xcc   :  { %v611_v52 = vadd.f32 1.0, %v926_v49  ;;  %v559_v54 = vpop.f32.mrf.mxu2 }
  0xcd   :  { %v928_v55 = vpop.eup %927  ;;  %929 = vpow2.f32 %v601_v50  ;;  %v342_v57 = vmul.f32 1.442695, %v335_v51  ;;  %v560_v58 = vadd.f32 %v559_v54, %v536_v46  ;;  %v97_v50 = vpop.permute.xlu2 %96 }
  0xce   :  { %931 = vrcp.f32 %v611_v52  ;;  %v352_v59 = vadd.f32 1.0, %v928_v55  ;;  %v300_v60 = vpop.f32.mrf.mxu1 }
  0xcf   :  { %933 = vpow2.f32 %v342_v57  ;;  %v1211_v61 = vadd.f32 %v583_v45, %v560_v58  ;;  %v301_v62 = vadd.f32 %v300_v60, %v277_v56  ;;  %v542_v49 = vpop.f32.mrf.mxu3 }
  0xd0   :  { %935 = vrcp.f32 %v352_v59  ;;  %v543_v53 = vadd.f32 %v542_v49, %v97_v50 }
  0xd1   :  { %v595_v0 = vsub.f32 0.0, %v1211_v61  ;;  %v1215_v1 = vadd.f32 %v1188_v8, %v301_v62  ;;  %v588_v37 = vpop.f32.mrf.mxu0 }
  0xd3   :  { %v930_v3 = vpop.eup %929  ;;  %v603_v5 = vmul.f32 1.442695, %v595_v0  ;;  %v336_v6 = vsub.f32 0.0, %v1215_v1 }
  0xd4   :  { %v932_v7 = vpop.eup %931  ;;  %v612_v10 = vadd.f32 1.0, %v930_v3  ;;  %v561_v13 = vpop.f32.mrf.mxu2 }
  0xd5   :  { %v934_v16 = vpop.eup %933  ;;  %v623_v18 = vmul.f32 %v932_v7, %v579_v28  ;;  %937 = vpow2.f32 %v603_v5  ;;  %v344_v20 = vmul.f32 1.442695, %v336_v6  ;;  %v562_v21 = vadd.f32 %v561_v13, %v538_v4 }
  0xd6   :  { %v936_v22 = vpop.eup %935  ;;  %939 = vrcp.f32 %v612_v10  ;;  %v353_v8 = vadd.f32 1.0, %v934_v16  ;;  %v302_v24 = vpop.f32.mrf.mxu1  ;;  %v541_v28 = vadd.f32 %v540_v23, %v92_v25 }
  0xd7   :  { %862 = vst [vmem:[%s1276_s3 + $0x30] sm:$0xff] %v623_v18  ;;  %v364_v26 = vmul.f32 %v936_v22, %v1202_v31  ;;  %941 = vpow2.f32 %v344_v20  ;;  %v1223_v12 = vadd.f32 %v585_v2, %v562_v21  ;;  %v303_v27 = vadd.f32 %v302_v24, %v279_v9 }
  0xd8   :  { %943 = vrcp.f32 %v353_v8 }
  0xd9   :  { %370 = vst [vmem:[%s1276_s3] sm:$0xff] %v364_v26  ;;  %v596_v29 = vsub.f32 0.0, %v1223_v12  ;;  %v1230_v30 = vadd.f32 %v1190_v11, %v303_v27  ;;  %v590_v3 = vpop.f32.mrf.mxu0 }
  0xdb   :  { %v938_v32 = vpop.eup %937  ;;  %v605_v33 = vmul.f32 1.442695, %v596_v29  ;;  %v337_v34 = vsub.f32 0.0, %v1230_v30 }
  0xdc   :  { %v940_v31 = vpop.eup %939  ;;  %v613_v36 = vadd.f32 1.0, %v938_v32  ;;  %v564_v38 = vpop.f32.mrf.mxu2 }
  0xdd   :  { %v942_v39 = vpop.eup %941  ;;  %v624_v40 = vmul.f32 %v940_v31, %v1205_v43  ;;  %945 = vpow2.f32 %v605_v33  ;;  %v346_v41 = vmul.f32 1.442695, %v337_v34  ;;  %v565_v42 = vadd.f32 %v564_v38, %v541_v28 }
  0xde   :  { %v944_v44 = vpop.eup %943  ;;  %947 = vrcp.f32 %v613_v36  ;;  %v354_v11 = vadd.f32 1.0, %v942_v39  ;;  %v305_v45 = vpop.f32.mrf.mxu1 }
  0xdf   :  { %863 = vst [vmem:[%s1276_s3 + $0x38] sm:$0xff] %v624_v40  ;;  %v365_v46 = vmul.f32 %v944_v44, %v1208_v48  ;;  %949 = vpow2.f32 %v346_v41  ;;  %v589_v15 = vadd.f32 %v588_v37, %v565_v42  ;;  %v306_v47 = vadd.f32 %v305_v45, %v282_v35 }
  0xe0   :  { %951 = vrcp.f32 %v354_v11  ;;  %v284_v48 = vadd.f32 %v1200_v19, %v97_v50 }
  0xe1   :  { %371 = vst [vmem:[%s1276_s3 + $0x8] sm:$0xff] %v365_v46  ;;  %v597_v43 = vsub.f32 0.0, %v589_v15  ;;  %v330_v51 = vadd.f32 %v1194_v14, %v306_v47 }
  0xe3   :  { %v946_v52 = vpop.eup %945  ;;  %v607_v54 = vmul.f32 1.442695, %v597_v43  ;;  %v338_v55 = vsub.f32 0.0, %v330_v51 }
  0xe4   :  { %v948_v56 = vpop.eup %947  ;;  %v614_v57 = vadd.f32 1.0, %v946_v52  ;;  %v566_v58 = vpop.f32.mrf.mxu2 }
  0xe5   :  { %v950_v59 = vpop.eup %949  ;;  %v625_v60 = vmul.f32 %v948_v56, %v1211_v61  ;;  %953 = vpow2.f32 %v607_v54  ;;  %v348_v62 = vmul.f32 1.442695, %v338_v55  ;;  %v567_v63 = vadd.f32 %v566_v58, %v543_v53 }
  0xe6   :  { %v952_v0 = vpop.eup %951  ;;  %955 = vrcp.f32 %v614_v57  ;;  %v355_v2 = vadd.f32 1.0, %v950_v59  ;;  %v307_v14 = vpop.f32.mrf.mxu1 }
  0xe7   :  { %864 = vst [vmem:[%s1276_s3 + $0x40] sm:$0xff] %v625_v60  ;;  %v366_v4 = vmul.f32 %v952_v0, %v1215_v1  ;;  %957 = vpow2.f32 %v348_v62  ;;  %v591_v19 = vadd.f32 %v590_v3, %v567_v63  ;;  %v308_v5 = vadd.f32 %v307_v14, %v284_v48 }
  0xe8   :  { %959 = vrcp.f32 %v355_v2 }
  0xe9   :  { %372 = vst [vmem:[%s1276_s3 + $0x10] sm:$0xff] %v366_v4  ;;  %v598_v61 = vsub.f32 0.0, %v591_v19  ;;  %v332_v6 = vadd.f32 %v1198_v17, %v308_v5 }
  0xeb   :  { %v954_v7 = vpop.eup %953  ;;  %v609_v9 = vmul.f32 1.442695, %v598_v61  ;;  %v339_v10 = vsub.f32 0.0, %v332_v6 }
  0xec   :  { %v956_v13 = vpop.eup %955  ;;  %v615_v16 = vadd.f32 1.0, %v954_v7 }
  0xed   :  { %v958_v18 = vpop.eup %957  ;;  %v626_v20 = vmul.f32 %v956_v13, %v1223_v12  ;;  %961 = vpow2.f32 %v609_v9  ;;  %v350_v1 = vmul.f32 1.442695, %v339_v10 }
  0xee   :  { %v960_v21 = vpop.eup %959  ;;  %963 = vrcp.f32 %v615_v16  ;;  %v356_v22 = vadd.f32 1.0, %v958_v18 }
  0xef   :  { %865 = vst [vmem:[%s1276_s3 + $0x48] sm:$0xff] %v626_v20  ;;  %v367_v8 = vmul.f32 %v960_v21, %v1230_v30  ;;  %965 = vpow2.f32 %v350_v1 }
  0xf0   :  { %967 = vrcp.f32 %v356_v22 }
  0xf1   :  { %373 = vst [vmem:[%s1276_s3 + $0x18] sm:$0xff] %v367_v8 }
  0xf3   :  { %v962_v17 = vpop.eup %961 }
  0xf4   :  { %v964_v23 = vpop.eup %963  ;;  %v616_v24 = vadd.f32 1.0, %v962_v17 }
  0xf5   :  { %v966_v25 = vpop.eup %965  ;;  %v627_v26 = vmul.f32 %v964_v23, %v589_v15 }
  0xf6   :  { %v968_v12 = vpop.eup %967  ;;  %969 = vrcp.f32 %v616_v24  ;;  %v357_v27 = vadd.f32 1.0, %v966_v25 }
  0xf7   :  { %866 = vst [vmem:[%s1276_s3 + $0x50] sm:$0xff] %v627_v26  ;;  %v368_v28 = vmul.f32 %v968_v12, %v330_v51 }
  0xf8   :  { %971 = vrcp.f32 %v357_v27 }
  0xf9   :  { %374 = vst [vmem:[%s1276_s3 + $0x20] sm:$0xff] %v368_v28 }
  0xfc   :  { %v970_v29 = vpop.eup %969 }
  0xfd   :  { %v628_v30 = vmul.f32 %v970_v29, %v591_v19 }
  0xfe   :  { %v972_v32 = vpop.eup %971 }
  0xff   :  { %867 = vst [vmem:[%s1276_s3 + $0x58] sm:$0xff] %v628_v30  ;;  %v369_v33 = vmul.f32 %v972_v32, %v332_v6 }
 0x101   :  { %375 = vst [vmem:[%s1276_s3 + $0x28] sm:$0xff] %v369_v33 }

// kernel: encoder_forward.9
= control target key start
LH: loop header
LB: loop body
LE: loop exit
PB: predicated region body
PF: predicated region fallthrough
CT: control target
= control target key end

     0   :  { %v618_v0 = vmov 0   ;;  %vm89_vm0 = vcmask 392192   ;;  %s988_s2 = inlined_call_operand.vmem [shape: f32[64,1], index: 2, kind: input, shape index: {}]   ;;  %s989_s0 = inlined_call_operand.vmem [shape: bf16[2,48,128], index: 0, kind: input, shape index: {}]   ;;  %s990_s1 = inlined_call_operand.vmem [shape: bf16[64,48], index: 1, kind: input, shape index: {}]   ;;  %s991_s3 = inlined_call_operand.vmem [shape: f32[64,1], index: 3, kind: input, shape index: {}]   ;;  %s992_s4 = inlined_call_operand.vmem [shape: f32[2,64,128], index: 4, kind: output, shape index: {0}]   ;;  %s993_s5 = inlined_call_operand.vmem [shape: f32[2,64,128], index: 5, kind: output, shape index: {1}]   ;;  %s994_s6 = inlined_call_operand.vmem [shape: f32[2,64,128], index: 6, kind: output, shape index: {2}]  }
   0x1   :  { %552 = vset.pattern.permute.xlu1 %v618_v0  ;;  %551 = vset.pattern.permute.xlu0 %v618_v0  ;;  %v31_v1 = vld [vmem:[%s988_s2 + $0x10] sm:$0xff]  ;;  %v29_v2 = vld [vmem:[%s988_s2] sm:$0xff]  ;;  %v543_v4 = vld [vmem:[%s989_s0 + $0x28] sm:$0xff] }
   0x2   :  { %v540_v3 = vld [vmem:[%s989_s0 + $0x10] sm:$0xff]  ;;  %151 = vperm.xlu1 %552, %v31_v1   ;;  %141 = vperm.xlu0 %551, %v29_v2   ;;  %v539_v5 = vld [vmem:[%s989_s0 + $0x8] sm:$0xff]  ;;  %v542_v6 = vld [vmem:[%s989_s0 + $0x20] sm:$0xff] }
   0x3   :  { %107 = vmatpush.bf16.msra.mxu0 %v540_v3  ;;  %544 = vmatpush.bf16.msra.mxu2 %v540_v3  ;;  %v33_v7 = vld [vmem:[%s988_s2 + $0x20] sm:$0xff]  ;;  %v32_v8 = vld [vmem:[%s988_s2 + $0x18] sm:$0xff]  ;;  %v30_v9 = vld [vmem:[%s988_s2 + $0x8] sm:$0xff] }
   0x4   :  { %329 = vmatpush.bf16.msra.mxu1 %v543_v4  ;;  %547 = vmatpush.bf16.msra.mxu3 %v543_v4  ;;  %v538_v10 = vld [vmem:[%s989_s0] sm:$0xff]  ;;  %v541_v11 = vld [vmem:[%s989_s0 + $0x18] sm:$0xff]  ;;  %v536_v13 = vld [vmem:[%s990_s1 + $0x10] sm:$0xff] }
   0x5   :  { %553 = vset.pattern.permute.xlu2 %v618_v0  ;;  %v534_v12 = vld [vmem:[%s990_s1] sm:$0xff]  ;;  %v34_v14 = vld [vmem:[%s988_s2 + $0x28] sm:$0xff]  ;;  %v36_v15 = vld [vmem:[%s988_s2 + $0x38] sm:$0xff] }
   0x6   :  { %161 = vperm.xlu2 %553, %v33_v7   ;;  %v35_v16 = vld [vmem:[%s988_s2 + $0x30] sm:$0xff]  ;;  %v37_v17 = vld [vmem:[%s991_s3] sm:$0xff]  ;;  %v38_v19 = vld [vmem:[%s991_s3 + $0x8] sm:$0xff] }
   0x7   :  { %108 = vmatpush.bf16.msra.mxu0 %v539_v5  ;;  %545 = vmatpush.bf16.msra.mxu2 %v539_v5  ;;  %v39_v18 = vld [vmem:[%s991_s3 + $0x10] sm:$0xff]  ;;  %v535_v20 = vld [vmem:[%s990_s1 + $0x8] sm:$0xff]  ;;  %v537_v21 = vld [vmem:[%s990_s1 + $0x18] sm:$0xff] }
   0x8   :  { %330 = vmatpush.bf16.msra.mxu1 %v542_v6  ;;  %548 = vmatpush.bf16.msra.mxu3 %v542_v6  ;;  %v40_v22 = vld [vmem:[%s991_s3 + $0x18] sm:$0xff]  ;;  %v42_v23 = vld [vmem:[%s991_s3 + $0x28] sm:$0xff]  ;;  %v41_v24 = vld [vmem:[%s991_s3 + $0x20] sm:$0xff] }
   0x9   :  { %v43_v25 = vld [vmem:[%s991_s3 + $0x30] sm:$0xff]  ;;  %v44_v26 = vld [vmem:[%s991_s3 + $0x38] sm:$0xff] }
   0xa   :  { %156 = vperm.xlu1 %552, %v32_v8   ;;  %146 = vperm.xlu0 %551, %v30_v9  }
   0xb   :  { %109 = vmatpush.bf16.msra.mxu0 %v538_v10  ;;  %546 = vmatpush.bf16.msra.mxu2 %v538_v10 }
   0xc   :  { %331 = vmatpush.bf16.msra.mxu1 %v541_v11  ;;  %549 = vmatpush.bf16.msra.mxu3 %v541_v11 }
   0xe   :  { %484 = vmatmul.msk.bf16.vlgmr.msra.gmra.mxu0 %vm89_vm0, %v534_v12  ;;  %486 = vmatmul.msk.bf16.vlgmr.msra.gmra.mxu2 %vm89_vm0, %v536_v13 }
   0xf   :  { %506 = vmatmul.msk.bf16.vlgmr.msra.gmra.mxu1 %vm89_vm0, %v534_v12  ;;  %508 = vmatmul.msk.bf16.vlgmr.msra.gmra.mxu3 %vm89_vm0, %v536_v13 }
  0x10   :  { %166 = vperm.xlu2 %553, %v34_v14  }
  0x12   :  { %176 = vperm.xlu1 %552, %v36_v15   ;;  %171 = vperm.xlu0 %551, %v35_v16  }
  0x18   :  { %189 = vperm.xlu2 %553, %v37_v17  }
  0x1a   :  { %199 = vperm.xlu1 %552, %v39_v18   ;;  %194 = vperm.xlu0 %551, %v38_v19  }
  0x1e   :  { %485 = vmatmul.msk.bf16.gmra.mxu0 %vm89_vm0, %v535_v20  ;;  %487 = vmatmul.msk.bf16.gmra.mxu2 %vm89_vm0, %v537_v21 }
  0x1f   :  { %507 = vmatmul.msk.bf16.gmra.mxu1 %vm89_vm0, %v535_v20  ;;  %509 = vmatmul.msk.bf16.gmra.mxu3 %vm89_vm0, %v537_v21 }
  0x20   :  { %204 = vperm.xlu2 %553, %v40_v22  }
  0x22   :  { %214 = vperm.xlu1 %552, %v42_v23   ;;  %209 = vperm.xlu0 %551, %v41_v24  }
  0x28   :  { %219 = vperm.xlu2 %553, %v43_v25  }
  0x2a   :  { %224 = vperm.xlu0 %551, %v44_v26  }
  0x60   :  { %v162_v29 = vpop.permute.xlu2 %161 }
  0x6a   :  { %v167_v32 = vpop.permute.xlu2 %166 }
  0x72   :  { %v190_v38 = vpop.permute.xlu2 %189 }
  0x74   :  { %v740_v27 = vpop.permute.xlu1 %151  ;;  %v142_v28 = vpop.permute.xlu0 %141 }
  0x7a   :  { %v805_v4 = vpop.permute.xlu2 %204 }
  0x7c   :  { %v147_v30 = vpop.permute.xlu0 %146  ;;  %v742_v31 = vpop.permute.xlu1 %156 }
  0x84   :  { %v744_v33 = vpop.permute.xlu0 %171  ;;  %v746_v34 = vpop.permute.xlu1 %176 }
  0x8b   :  { %v111_v35 = vpop.f32.mrf.mxu0 }
  0x8c   :  { %v195_v36 = vpop.permute.xlu0 %194  ;;  %131 = vst [vmem:[%s992_s4] sm:$0xff] %v111_v35  ;;  %v179_v37 = vmul.f32 %v142_v28, %v111_v35  ;;  %v333_v39 = vpop.f32.mrf.mxu1 }
  0x8d   :  { %510 = vst [vmem:[%s992_s4 + $0x40] sm:$0xff] %v333_v39  ;;  %v362_v41 = vmul.f32 %v333_v39, %v142_v28  ;;  %v763_v44 = vpop.permute.xlu1 %199 }
  0x8e   :  { %v751_v40 = vadd.f32 %v190_v38, %v179_v37 }
  0x8f   :  { %v761_v43 = vadd.f32 %v362_v41, %v190_v38 }
  0x90   :  { %235 = vst [vmem:[%s993_s5] sm:$0xff] %v751_v40  ;;  %v243_v42 = vsub.f32 0.0, %v751_v40 }
  0x91   :  { %v121_v45 = vpop.f32.mrf.mxu2  ;;  %518 = vst [vmem:[%s993_s5 + $0x40] sm:$0xff] %v761_v43  ;;  %v387_v47 = vsub.f32 0.0, %v761_v43 }
  0x92   :  { %v251_v46 = vmul.f32 1.442695, %v243_v42  ;;  %v183_v48 = vmul.f32 %v162_v29, %v121_v45  ;;  %v343_v49 = vpop.f32.mrf.mxu3  ;;  %135 = vst [vmem:[%s992_s4 + $0x20] sm:$0xff] %v121_v45 }
  0x93   :  { %v366_v50 = vmul.f32 %v343_v49, %v162_v29  ;;  %v113_v51 = vpop.f32.mrf.mxu0  ;;  %v395_v52 = vmul.f32 1.442695, %v387_v47  ;;  %514 = vst [vmem:[%s992_s4 + $0x60] sm:$0xff] %v343_v49 }
  0x94   :  { %554 = vpow2.f32 %v251_v46  ;;  %v210_v53 = vpop.permute.xlu0 %209  ;;  %v180_v54 = vmul.f32 %v147_v30, %v113_v51  ;;  %132 = vst [vmem:[%s992_s4 + $0x8] sm:$0xff] %v113_v51  ;;  %v335_v57 = vpop.f32.mrf.mxu1 }
  0x95   :  { %v776_v55 = vadd.f32 %v210_v53, %v183_v48  ;;  %v778_v56 = vadd.f32 %v366_v50, %v210_v53  ;;  %556 = vpow2.f32 %v395_v52  ;;  %511 = vst [vmem:[%s992_s4 + $0x48] sm:$0xff] %v335_v57  ;;  %v363_v59 = vmul.f32 %v335_v57, %v147_v30  ;;  %v215_v10 = vpop.permute.xlu1 %214  ;;  %v220_v46 = vpop.permute.xlu2 %219 }
  0x96   :  { %v783_v58 = vadd.f32 %v195_v36, %v180_v54 }
  0x97   :  { %239 = vst [vmem:[%s993_s5 + $0x20] sm:$0xff] %v776_v55  ;;  %v247_v60 = vsub.f32 0.0, %v776_v55  ;;  %v391_v61 = vsub.f32 0.0, %v778_v56  ;;  %v799_v63 = vadd.f32 %v363_v59, %v195_v36 }
  0x98   :  { %522 = vst [vmem:[%s993_s5 + $0x60] sm:$0xff] %v778_v56  ;;  %v244_v62 = vsub.f32 0.0, %v783_v58 }
  0x99   :  { %v259_v0 = vmul.f32 1.442695, %v247_v60  ;;  %v403_v1 = vmul.f32 1.442695, %v391_v61  ;;  %236 = vst [vmem:[%s993_s5 + $0x8] sm:$0xff] %v783_v58  ;;  %v123_v2 = vpop.f32.mrf.mxu2  ;;  %v388_v6 = vsub.f32 0.0, %v799_v63 }
  0x9a   :  { %v555_v3 = vpop.eup %554  ;;  %v253_v5 = vmul.f32 1.442695, %v244_v62  ;;  %519 = vst [vmem:[%s993_s5 + $0x48] sm:$0xff] %v799_v63  ;;  %v184_v7 = vmul.f32 %v167_v32, %v123_v2  ;;  %v345_v8 = vpop.f32.mrf.mxu3 }
  0x9b   :  { %v267_v9 = vadd.f32 1.0, %v555_v3  ;;  %558 = vpow2.f32 %v259_v0  ;;  %136 = vst [vmem:[%s992_s4 + $0x28] sm:$0xff] %v123_v2  ;;  %v367_v11 = vmul.f32 %v345_v8, %v167_v32  ;;  %v116_v12 = vpop.f32.mrf.mxu0  ;;  %v557_v13 = vpop.eup %556  ;;  %v397_v14 = vmul.f32 1.442695, %v388_v6 }
  0x9c   :  { %560 = vpow2.f32 %v403_v1  ;;  %v815_v15 = vadd.f32 %v215_v10, %v184_v7  ;;  %515 = vst [vmem:[%s992_s4 + $0x68] sm:$0xff] %v345_v8  ;;  %v181_v16 = vmul.f32 %v740_v27, %v116_v12  ;;  %v411_v17 = vadd.f32 1.0, %v557_v13  ;;  %v338_v19 = vpop.f32.mrf.mxu1  ;;  %v225_v13 = vpop.permute.xlu0 %224 }
  0x9d   :  { %562 = vrcp.f32 %v267_v9  ;;  %v821_v18 = vadd.f32 %v367_v11, %v215_v10  ;;  %133 = vst [vmem:[%s992_s4 + $0x10] sm:$0xff] %v116_v12  ;;  %v364_v22 = vmul.f32 %v338_v19, %v740_v27 }
  0x9e   :  { %564 = vpow2.f32 %v253_v5  ;;  %240 = vst [vmem:[%s993_s5 + $0x28] sm:$0xff] %v815_v15  ;;  %v248_v20 = vsub.f32 0.0, %v815_v15  ;;  %v832_v21 = vadd.f32 %v763_v44, %v181_v16 }
  0x9f   :  { %566 = vrcp.f32 %v411_v17  ;;  %523 = vst [vmem:[%s993_s5 + $0x68] sm:$0xff] %v821_v18  ;;  %v392_v23 = vsub.f32 0.0, %v821_v18  ;;  %v846_v26 = vadd.f32 %v364_v22, %v763_v44 }
  0xa0   :  { %568 = vpow2.f32 %v397_v14  ;;  %v261_v24 = vmul.f32 1.442695, %v248_v20  ;;  %237 = vst [vmem:[%s993_s5 + $0x10] sm:$0xff] %v832_v21  ;;  %v245_v25 = vsub.f32 0.0, %v832_v21 }
  0xa1   :  { %v559_v27 = vpop.eup %558  ;;  %v405_v28 = vmul.f32 1.442695, %v392_v23  ;;  %512 = vst [vmem:[%s992_s4 + $0x50] sm:$0xff] %v338_v19  ;;  %v126_v29 = vpop.f32.mrf.mxu2  ;;  %v389_v36 = vsub.f32 0.0, %v846_v26 }
  0xa2   :  { %v561_v30 = vpop.eup %560  ;;  %v271_v32 = vadd.f32 1.0, %v559_v27  ;;  %570 = vpow2.f32 %v261_v24  ;;  %v255_v35 = vmul.f32 1.442695, %v245_v25  ;;  %520 = vst [vmem:[%s993_s5 + $0x50] sm:$0xff] %v846_v26  ;;  %v348_v37 = vpop.f32.mrf.mxu3  ;;  %v185_v41 = vmul.f32 %v744_v33, %v126_v29 }
  0xa3   :  { %v563_v38 = vpop.eup %562  ;;  %v415_v39 = vadd.f32 1.0, %v561_v30  ;;  %572 = vpow2.f32 %v405_v28  ;;  %137 = vst [vmem:[%s992_s4 + $0x30] sm:$0xff] %v126_v29  ;;  %v368_v42 = vmul.f32 %v348_v37, %v744_v33  ;;  %v118_v44 = vpop.f32.mrf.mxu0  ;;  %v399_v48 = vmul.f32 1.442695, %v389_v36 }
  0xa4   :  { %v565_v45 = vpop.eup %564  ;;  %v283_v47 = vmul.f32 %v563_v38, %v751_v40  ;;  %574 = vrcp.f32 %v271_v32  ;;  %516 = vst [vmem:[%s992_s4 + $0x70] sm:$0xff] %v348_v37  ;;  %v182_v49 = vmul.f32 %v742_v31, %v118_v44  ;;  %v866_v52 = vadd.f32 %v220_v46, %v185_v41  ;;  %v340_v33 = vpop.f32.mrf.mxu1 }
  0xa5   :  { %v567_v50 = vpop.eup %566  ;;  %576 = vrcp.f32 %v415_v39  ;;  %v268_v51 = vadd.f32 1.0, %v565_v45  ;;  %v868_v53 = vadd.f32 %v368_v42, %v220_v46  ;;  %134 = vst [vmem:[%s992_s4 + $0x18] sm:$0xff] %v118_v44  ;;  %v365_v59 = vmul.f32 %v340_v33, %v742_v31 }
  0xa6   :  { %v569_v40 = vpop.eup %568  ;;  %291 = vst [vmem:[%s994_s6] sm:$0xff] %v283_v47  ;;  %v427_v54 = vmul.f32 %v567_v50, %v761_v43  ;;  %578 = vpow2.f32 %v255_v35  ;;  %v878_v57 = vadd.f32 %v805_v4, %v182_v49  ;;  %v249_v61 = vsub.f32 0.0, %v866_v52 }
  0xa7   :  { %580 = vrcp.f32 %v268_v51  ;;  %v412_v60 = vadd.f32 1.0, %v569_v40  ;;  %241 = vst [vmem:[%s993_s5 + $0x30] sm:$0xff] %v866_v52  ;;  %v393_v62 = vsub.f32 0.0, %v868_v53  ;;  %v892_v31 = vadd.f32 %v365_v59, %v805_v4 }
  0xa8   :  { %v571_v0 = vpop.eup %570  ;;  %526 = vst [vmem:[%s994_s6 + $0x40] sm:$0xff] %v427_v54  ;;  %582 = vpow2.f32 %v399_v48  ;;  %v246_v43 = vsub.f32 0.0, %v878_v57  ;;  %v263_v3 = vmul.f32 1.442695, %v249_v61 }
  0xa9   :  { %v573_v1 = vpop.eup %572  ;;  %584 = vrcp.f32 %v412_v60  ;;  %v272_v2 = vadd.f32 1.0, %v571_v0  ;;  %524 = vst [vmem:[%s993_s5 + $0x70] sm:$0xff] %v868_v53  ;;  %v128_v5 = vpop.f32.mrf.mxu2  ;;  %v407_v8 = vmul.f32 1.442695, %v393_v62  ;;  %v390_v4 = vsub.f32 0.0, %v892_v31 }
  0xaa   :  { %v575_v6 = vpop.eup %574  ;;  %v416_v7 = vadd.f32 1.0, %v573_v1  ;;  %238 = vst [vmem:[%s993_s5 + $0x18] sm:$0xff] %v878_v57  ;;  %v186_v9 = vmul.f32 %v746_v34, %v128_v5  ;;  %v350_v10 = vpop.f32.mrf.mxu3  ;;  %v257_v19 = vmul.f32 1.442695, %v246_v43 }
  0xab   :  { %v577_v11 = vpop.eup %576  ;;  %v287_v12 = vmul.f32 %v575_v6, %v776_v55  ;;  %586 = vrcp.f32 %v272_v2  ;;  %513 = vst [vmem:[%s992_s4 + $0x58] sm:$0xff] %v340_v33  ;;  %v369_v14 = vmul.f32 %v350_v10, %v746_v34  ;;  %v401_v24 = vmul.f32 1.442695, %v390_v4 }
  0xac   :  { %v579_v16 = vpop.eup %578  ;;  %v431_v17 = vmul.f32 %v577_v11, %v778_v56  ;;  %588 = vrcp.f32 %v416_v7  ;;  %521 = vst [vmem:[%s993_s5 + $0x58] sm:$0xff] %v892_v31  ;;  %v914_v20 = vadd.f32 %v225_v13, %v186_v9 }
  0xad   :  { %v581_v55 = vpop.eup %580  ;;  %295 = vst [vmem:[%s994_s6 + $0x20] sm:$0xff] %v287_v12  ;;  %v269_v22 = vadd.f32 1.0, %v579_v16  ;;  %590 = vpow2.f32 %v263_v3  ;;  %v919_v34 = vadd.f32 %v369_v14, %v225_v13 }
  0xae   :  { %v583_v23 = vpop.eup %582  ;;  %530 = vst [vmem:[%s994_s6 + $0x60] sm:$0xff] %v431_v17  ;;  %v284_v56 = vmul.f32 %v581_v55, %v783_v58  ;;  %592 = vpow2.f32 %v407_v8  ;;  %v250_v25 = vsub.f32 0.0, %v914_v20 }
  0xaf   :  { %v585_v27 = vpop.eup %584  ;;  %594 = vrcp.f32 %v269_v22  ;;  %v413_v28 = vadd.f32 1.0, %v583_v23  ;;  %138 = vst [vmem:[%s992_s4 + $0x38] sm:$0xff] %v128_v5  ;;  %v394_v29 = vsub.f32 0.0, %v919_v34 }
  0xb0   :  { %292 = vst [vmem:[%s994_s6 + $0x8] sm:$0xff] %v284_v56  ;;  %v428_v30 = vmul.f32 %v585_v27, %v799_v63  ;;  %596 = vpow2.f32 %v257_v19  ;;  %v265_v58 = vmul.f32 1.442695, %v250_v25 }
  0xb1   :  { %v587_v32 = vpop.eup %586  ;;  %598 = vrcp.f32 %v413_v28  ;;  %242 = vst [vmem:[%s993_s5 + $0x38] sm:$0xff] %v914_v20  ;;  %v409_v35 = vmul.f32 1.442695, %v394_v29 }
  0xb2   :  { %v589_v36 = vpop.eup %588  ;;  %527 = vst [vmem:[%s994_s6 + $0x48] sm:$0xff] %v428_v30  ;;  %v288_v37 = vmul.f32 %v587_v32, %v815_v15  ;;  %600 = vpow2.f32 %v401_v24 }
  0xb3   :  { %v591_v38 = vpop.eup %590  ;;  %v432_v63 = vmul.f32 %v589_v36, %v821_v18  ;;  %602 = vpow2.f32 %v265_v58  ;;  %517 = vst [vmem:[%s992_s4 + $0x78] sm:$0xff] %v350_v10 }
  0xb4   :  { %v593_v39 = vpop.eup %592  ;;  %296 = vst [vmem:[%s994_s6 + $0x28] sm:$0xff] %v288_v37  ;;  %v273_v41 = vadd.f32 1.0, %v591_v38  ;;  %604 = vpow2.f32 %v409_v35 }
  0xb5   :  { %v595_v42 = vpop.eup %594  ;;  %531 = vst [vmem:[%s994_s6 + $0x68] sm:$0xff] %v432_v63  ;;  %v417_v15 = vadd.f32 1.0, %v593_v39 }
  0xb6   :  { %v597_v44 = vpop.eup %596  ;;  %v285_v18 = vmul.f32 %v595_v42, %v832_v21  ;;  %606 = vrcp.f32 %v273_v41  ;;  %525 = vst [vmem:[%s993_s5 + $0x78] sm:$0xff] %v919_v34 }
  0xb7   :  { %v599_v45 = vpop.eup %598  ;;  %608 = vrcp.f32 %v417_v15  ;;  %v270_v46 = vadd.f32 1.0, %v597_v44 }
  0xb8   :  { %v601_v47 = vpop.eup %600  ;;  %293 = vst [vmem:[%s994_s6 + $0x10] sm:$0xff] %v285_v18  ;;  %v429_v48 = vmul.f32 %v599_v45, %v846_v26 }
  0xb9   :  { %v603_v49 = vpop.eup %602  ;;  %610 = vrcp.f32 %v270_v46  ;;  %v414_v50 = vadd.f32 1.0, %v601_v47 }
  0xba   :  { %v605_v21 = vpop.eup %604  ;;  %528 = vst [vmem:[%s994_s6 + $0x50] sm:$0xff] %v429_v48  ;;  %v274_v51 = vadd.f32 1.0, %v603_v49 }
  0xbb   :  { %612 = vrcp.f32 %v414_v50  ;;  %v418_v33 = vadd.f32 1.0, %v605_v21 }
  0xbc   :  { %v607_v40 = vpop.eup %606  ;;  %614 = vrcp.f32 %v274_v51 }
  0xbd   :  { %v609_v54 = vpop.eup %608  ;;  %v289_v59 = vmul.f32 %v607_v40, %v866_v52  ;;  %616 = vrcp.f32 %v418_v33 }
  0xbe   :  { %v433_v60 = vmul.f32 %v609_v54, %v868_v53 }
  0xbf   :  { %v611_v26 = vpop.eup %610  ;;  %297 = vst [vmem:[%s994_s6 + $0x30] sm:$0xff] %v289_v59 }
  0xc0   :  { %532 = vst [vmem:[%s994_s6 + $0x70] sm:$0xff] %v433_v60  ;;  %v286_v61 = vmul.f32 %v611_v26, %v878_v57 }
  0xc1   :  { %v613_v62 = vpop.eup %612 }
  0xc2   :  { %v615_v0 = vpop.eup %614  ;;  %294 = vst [vmem:[%s994_s6 + $0x18] sm:$0xff] %v286_v61  ;;  %v430_v52 = vmul.f32 %v613_v62, %v892_v31 }
  0xc3   :  { %v617_v53 = vpop.eup %616  ;;  %v290_v43 = vmul.f32 %v615_v0, %v914_v20 }
  0xc4   :  { %529 = vst [vmem:[%s994_s6 + $0x58] sm:$0xff] %v430_v52  ;;  %v434_v1 = vmul.f32 %v617_v53, %v919_v34 }
  0xc5   :  { %298 = vst [vmem:[%s994_s6 + $0x38] sm:$0xff] %v290_v43 }
  0xc6   :  { %533 = vst [vmem:[%s994_s6 + $0x78] sm:$0xff] %v434_v1 }

</bundles_post_ra>
